<compile_context>
chip_gen: v6e
topology: v6e:2x2x1
jax: 0.10.0
libtpu: 0.0.40
codegen_flags: <defaults>
</compile_context>

<pallas_src>
import functools
import math

import jax
import jax.numpy as jnp
from jax import lax
from jax.experimental import pallas as pl
from jax.experimental.pallas import tpu as pltpu

_LANE = 128
_EPS = 1e-5


# ------------------------------ small helpers -------------------------------

def _round_up(x: int, m: int) -> int:
    return ((x + m - 1) // m) * m


def _vmem_limit_bytes(*specs):
    """Footprint-derived scoped-VMEM limit: 2x (double-buffering) the summed
    operand/output bytes plus headroom, clamped to [4 MiB, 32 MiB]."""
    total = 0
    for s in specs:
        total += math.prod(s.shape) * jnp.dtype(s.dtype).itemsize
    return int(min(32 << 20, max(4 << 20, 2 * total + (1 << 20))))


def _const_spec(shape):
    """BlockSpec for a weight that is fully resident (same block for every b)."""
    zeros = (0,) * len(shape)
    return pl.BlockSpec(shape, lambda b: zeros)


# ------------------------- embedding (+pos) kernel ---------------------------

def _embed_kernel(feats_ref, pos_ref, w_ref, b_ref, o_ref):
    x = feats_ref[0].astype(jnp.bfloat16)                       # (T, Fpad)
    h = jnp.dot(x, w_ref[...], preferred_element_type=jnp.float32)
    o_ref[0] = (h + b_ref[...] + pos_ref[...]).astype(o_ref.dtype)


def embed(feats, pos, w, b):
    B, T, F = feats.shape
    C = w.shape[1]
    out_shape = jax.ShapeDtypeStruct((B, T, C), jnp.bfloat16)
    return pl.pallas_call(
        _embed_kernel,
        out_shape=out_shape,
        grid_spec=pltpu.PrefetchScalarGridSpec(
            num_scalar_prefetch=0,
            grid=(B,),
            in_specs=[
                pl.BlockSpec((1, T, F), lambda bb: (bb, 0, 0)),
                _const_spec((T, C)),
                _const_spec((F, C)),
                _const_spec((1, C)),
            ],
            out_specs=pl.BlockSpec((1, T, C), lambda bb: (bb, 0, 0)),
        ),
        compiler_params=pltpu.CompilerParams(
            dimension_semantics=("parallel",),
            vmem_limit_bytes=_vmem_limit_bytes(feats, pos, w, b, out_shape),
        ),
    )(feats, pos, w, b)


# -------------------- fully fused transformer block kernel -------------------

def _block_kernel(h_ref, ln1_g_ref, ln1_b_ref, wqkv_ref, bqkv_ref, wo_ref, bo_ref,
                  ln2_g_ref, ln2_b_ref, w1_ref, b1_ref, w2_ref, b2_ref, o_ref,
                  *, n_head):
    h = h_ref[0].astype(jnp.float32)                             # (T, C)
    T = h.shape[0]

    def layernorm(z, g, b):
        mu = jnp.mean(z, axis=-1, keepdims=True)
        var = jnp.mean(jnp.square(z - mu), axis=-1, keepdims=True)
        return (z - mu) * lax.rsqrt(var + _EPS) * g + b

    # ---- pre-LN1 + fused QKV / causal attention / out-proj + residual ----
    xn = layernorm(h, ln1_g_ref[...], ln1_b_ref[...]).astype(jnp.bfloat16)
    row = lax.broadcasted_iota(jnp.int32, (T, T), 0)
    col = lax.broadcasted_iota(jnp.int32, (T, T), 1)
    causal = col <= row

    h = h + bo_ref[...]                                          # residual + out-proj bias
    for hh in range(n_head):                                     # static unroll over heads
        q = jnp.dot(xn, wqkv_ref[0, hh],
                    preferred_element_type=jnp.float32) + bqkv_ref[0, hh]
        k = jnp.dot(xn, wqkv_ref[1, hh],
                    preferred_element_type=jnp.float32) + bqkv_ref[1, hh]
        v = jnp.dot(xn, wqkv_ref[2, hh],
                    preferred_element_type=jnp.float32) + bqkv_ref[2, hh]
        # q @ k^T (1/sqrt(Dh) is already folded into the Q weights/bias).
        s = lax.dot_general(q.astype(jnp.bfloat16), k.astype(jnp.bfloat16),
                            (((1,), (1,)), ((), ())),
                            preferred_element_type=jnp.float32)  # (T, T)
        s = jnp.where(causal, s, -1e30)
        m = jnp.max(s, axis=-1, keepdims=True)
        p = jnp.exp(s - m)
        p = p / jnp.sum(p, axis=-1, keepdims=True)
        o = jnp.dot(p.astype(jnp.bfloat16), v.astype(jnp.bfloat16),
                    preferred_element_type=jnp.float32)          # (T, Dh)
        h = h + jnp.dot(o.astype(jnp.bfloat16), wo_ref[hh],
                        preferred_element_type=jnp.float32)      # head -> out-proj

    # ---- pre-LN2 + MLP + residual ----
    xn2 = layernorm(h, ln2_g_ref[...], ln2_b_ref[...]).astype(jnp.bfloat16)
    ff = jnp.dot(xn2, w1_ref[...], preferred_element_type=jnp.float32) + b1_ref[...]
    ff = jnp.maximum(ff, 0.0).astype(jnp.bfloat16)
    h = h + jnp.dot(ff, w2_ref[...], preferred_element_type=jnp.float32) + b2_ref[...]
    o_ref[0] = h.astype(o_ref.dtype)


def transformer_block(h, lyr, *, n_head):
    B, T, C = h.shape
    Dh = C // n_head
    Hid = lyr["w1"].shape[1]
    out_shape = jax.ShapeDtypeStruct((B, T, C), jnp.bfloat16)
    args = (h, lyr["ln1_g"], lyr["ln1_b"], lyr["wqkv"], lyr["bqkv"],
            lyr["wo"], lyr["bo"], lyr["ln2_g"], lyr["ln2_b"],
            lyr["w1"], lyr["b1"], lyr["w2"], lyr["b2"])
    in_specs = [
        pl.BlockSpec((1, T, C), lambda bb: (bb, 0, 0)),
        _const_spec((1, C)), _const_spec((1, C)),
        _const_spec((3, n_head, C, Dh)), _const_spec((3, n_head, 1, Dh)),
        _const_spec((n_head, Dh, C)), _const_spec((1, C)),
        _const_spec((1, C)), _const_spec((1, C)),
        _const_spec((C, Hid)), _const_spec((1, Hid)),
        _const_spec((Hid, C)), _const_spec((1, C)),
    ]
    return pl.pallas_call(
        functools.partial(_block_kernel, n_head=n_head),
        out_shape=out_shape,
        grid_spec=pltpu.PrefetchScalarGridSpec(
            num_scalar_prefetch=0,
            grid=(B,),
            in_specs=in_specs,
            out_specs=pl.BlockSpec((1, T, C), lambda bb: (bb, 0, 0)),
        ),
        compiler_params=pltpu.CompilerParams(
            dimension_semantics=("parallel",),
            vmem_limit_bytes=_vmem_limit_bytes(*args, out_shape),
        ),
    )(*args)


# -------------------- ln_f + head projection (+ MSE loss) --------------------

def _ln_head_logits(h_ref, g_ref, beta_ref, w_ref, b_ref):
    x = h_ref[0].astype(jnp.float32)
    mu = jnp.mean(x, axis=-1, keepdims=True)
    var = jnp.mean(jnp.square(x - mu), axis=-1, keepdims=True)
    xn = ((x - mu) * lax.rsqrt(var + _EPS) * g_ref[...] + beta_ref[...]
          ).astype(jnp.bfloat16)
    return jnp.dot(xn, w_ref[...], preferred_element_type=jnp.float32) + b_ref[...]


def _head_kernel(h_ref, g_ref, beta_ref, w_ref, b_ref, pred_ref):
    pred_ref[0] = _ln_head_logits(h_ref, g_ref, beta_ref, w_ref, b_ref)


def _head_loss_kernel(h_ref, g_ref, beta_ref, w_ref, b_ref, t_ref,
                      pred_ref, loss_ref, *, inv_count):
    logits = _ln_head_logits(h_ref, g_ref, beta_ref, w_ref, b_ref)
    pred_ref[0] = logits
    diff = logits - t_ref[0]          # padded lanes are zero in both -> no effect
    sse = jnp.sum(jnp.sum(diff * diff, axis=-1, keepdims=True),
                  axis=0, keepdims=True)                         # (1, 1)
    # Per-batch partial loss, broadcast across 128 lanes (lane-dense store);
    # column 0 is read and the B partials summed outside the kernel.
    loss_ref[0] = jnp.broadcast_to(sse * inv_count, loss_ref.shape[1:])


def head_project(h, g, beta, w, b, target_pad=None, *, mse_count=None):
    B, T, C = h.shape
    Np = w.shape[1]
    pred_shape = jax.ShapeDtypeStruct((B, T, Np), jnp.float32)
    common_in = [
        pl.BlockSpec((1, T, C), lambda bb: (bb, 0, 0)),
        _const_spec((1, C)), _const_spec((1, C)),
        _const_spec((C, Np)), _const_spec((1, Np)),
    ]
    if target_pad is None:
        pred = pl.pallas_call(
            _head_kernel,
            out_shape=pred_shape,
            grid_spec=pltpu.PrefetchScalarGridSpec(
                num_scalar_prefetch=0, grid=(B,),
                in_specs=common_in,
                out_specs=pl.BlockSpec((1, T, Np), lambda bb: (bb, 0, 0)),
            ),
            compiler_params=pltpu.CompilerParams(
                dimension_semantics=("parallel",),
                vmem_limit_bytes=_vmem_limit_bytes(h, g, beta, w, b, pred_shape),
            ),
        )(h, g, beta, w, b)
        return pred, None

    loss_shape = jax.ShapeDtypeStruct((B, 1, _LANE), jnp.float32)
    inv_count = 1.0 / float(mse_count)
    pred, loss_parts = pl.pallas_call(
        functools.partial(_head_loss_kernel, inv_count=inv_count),
        out_shape=(pred_shape, loss_shape),
        grid_spec=pltpu.PrefetchScalarGridSpec(
            num_scalar_prefetch=0, grid=(B,),
            in_specs=common_in + [pl.BlockSpec((1, T, Np), lambda bb: (bb, 0, 0))],
            out_specs=(pl.BlockSpec((1, T, Np), lambda bb: (bb, 0, 0)),
                       pl.BlockSpec((1, 1, _LANE), lambda bb: (bb, 0, 0))),
        ),
        compiler_params=pltpu.CompilerParams(
            dimension_semantics=("parallel",),
            vmem_limit_bytes=_vmem_limit_bytes(h, g, beta, w, b, target_pad,
                                               pred_shape, loss_shape),
        ),
    )(h, g, beta, w, b, target_pad)
    loss = jnp.sum(loss_parts[:, 0, 0])
    return pred, loss


# ----------------------------- parameter prep --------------------------------

def init_params(key, mic_num, tot_timesteps, n_embd, n_hidden, n_head, n_layer):
    std = 0.02
    Dh = n_embd // n_head
    scale = 1.0 / math.sqrt(Dh)
    f_in = 3 * mic_num
    f_pad = _round_up(max(f_in, _LANE), _LANE)       # lane-dense embedding K
    n_pad = _round_up(max(mic_num, _LANE), _LANE)    # lane-dense head N
    keys = iter(jax.random.split(key, 4 * n_layer + 8))

    def nrm(shape):
        return std * jax.random.normal(next(keys), shape, jnp.float32)

    emb_w = jnp.zeros((f_pad, n_embd), jnp.float32).at[:f_in].set(nrm((f_in, n_embd)))
    head_w = jnp.zeros((n_embd, n_pad), jnp.float32).at[:, :mic_num].set(
        nrm((n_embd, mic_num)))

    params = {
        "pos_table": nrm((tot_timesteps, n_embd)),
        "emb_w": emb_w.astype(jnp.bfloat16),
        "emb_b": jnp.zeros((1, n_embd), jnp.float32),
        "layers": [],
        "lnf_g": jnp.ones((1, n_embd), jnp.float32),
        "lnf_b": jnp.zeros((1, n_embd), jnp.float32),
        "head_w": head_w.astype(jnp.bfloat16),
        "head_b": jnp.zeros((1, n_pad), jnp.float32),
    }
    for _ in range(n_layer):
        wqkv = nrm((n_embd, 3 * n_embd)).reshape(n_embd, 3, n_head, Dh)
        wqkv = jnp.transpose(wqkv, (1, 2, 0, 3))            # (3, H, C, Dh)
        wqkv = wqkv.at[0].multiply(scale)                   # fold 1/sqrt(Dh) into Q
        bqkv = jnp.zeros((3, n_head, 1, Dh), jnp.float32)   # (Q-bias fold is a no-op for zeros)
        wo = nrm((n_embd, n_embd)).reshape(n_head, Dh, n_embd)  # (H, Dh, C)
        params["layers"].append({
            "ln1_g": jnp.ones((1, n_embd), jnp.float32),
            "ln1_b": jnp.zeros((1, n_embd), jnp.float32),
            "wqkv": wqkv.astype(jnp.bfloat16),
            "bqkv": bqkv,
            "wo": wo.astype(jnp.bfloat16),
            "bo": jnp.zeros((1, n_embd), jnp.float32),
            "ln2_g": jnp.ones((1, n_embd), jnp.float32),
            "ln2_b": jnp.zeros((1, n_embd), jnp.float32),
            "w1": nrm((n_embd, n_hidden)).astype(jnp.bfloat16),
            "b1": jnp.zeros((1, n_hidden), jnp.float32),
            "w2": nrm((n_hidden, n_embd)).astype(jnp.bfloat16),
            "b2": jnp.zeros((1, n_embd), jnp.float32),
        })
    return params


# ------------------------------- model wiring --------------------------------

def prediction_model_forward(params, x, target=None, *, n_head):
    B, _, M, T = x.shape
    f_pad = params["emb_w"].shape[0]
    n_pad = params["head_w"].shape[1]

    # (B,3,M,T) -> (B,T,M,3) -> (B,T,3M), zero-padded to a lane-dense K.
    feats = jnp.transpose(x, (0, 3, 2, 1)).reshape(B, T, 3 * M)
    feats = jnp.pad(feats, ((0, 0), (0, 0), (0, f_pad - 3 * M)))
    pos = params["pos_table"][:T]

    h = embed(feats, pos, params["emb_w"], params["emb_b"])          # (B,T,C) bf16
    for lyr in params["layers"]:
        h = transformer_block(h, lyr, n_head=n_head)

    if target is None:  # inference: head-only kernel, no loss work
        pred_pad, _ = head_project(h, params["lnf_g"], params["lnf_b"],
                                   params["head_w"], params["head_b"])
        return pred_pad[:, :, :M], None

    tv = jnp.transpose(target, (0, 3, 2, 1))[..., 0]                 # (B,T,M)
    tv = jnp.pad(tv, ((0, 0), (0, 0), (0, n_pad - M)))
    pred_pad, loss = head_project(h, params["lnf_g"], params["lnf_b"],
                                  params["head_w"], params["head_b"],
                                  target_pad=tv, mse_count=B * T * M)
    return pred_pad[:, :, :M], loss


# ------------------------ pure-JAX f32 reference ------------------------------

def _reference_forward(params, x, target, *, n_head):
    B, _, M, T = x.shape
    f32 = lambda a: a.astype(jnp.float32)
    f_pad = params["emb_w"].shape[0]

    feats = jnp.transpose(x, (0, 3, 2, 1)).reshape(B, T, 3 * M)
    feats = jnp.pad(feats, ((0, 0), (0, 0), (0, f_pad - 3 * M)))
    h = feats @ f32(params["emb_w"]) + params["emb_b"] + params["pos_table"][:T][None]

    def ln(z, g, b):
        mu = z.mean(-1, keepdims=True)
        var = ((z - mu) ** 2).mean(-1, keepdims=True)
        return (z - mu) * lax.rsqrt(var + _EPS) * g + b

    mask = jnp.tril(jnp.ones((T, T), dtype=bool))
    for lyr in params["layers"]:
        xn = ln(h, lyr["ln1_g"], lyr["ln1_b"])
        attn = h + lyr["bo"]
        for hh in range(n_head):
            q = xn @ f32(lyr["wqkv"][0, hh]) + lyr["bqkv"][0, hh]
            k = xn @ f32(lyr["wqkv"][1, hh]) + lyr["bqkv"][1, hh]
            v = xn @ f32(lyr["wqkv"][2, hh]) + lyr["bqkv"][2, hh]
            s = jnp.einsum('btd,bsd->bts', q, k)
            s = jnp.where(mask, s, -1e30)
            p = jax.nn.softmax(s, axis=-1)
            attn = attn + jnp.einsum('bts,bsd->btd', p, v) @ f32(lyr["wo"][hh])
        h = attn
        xn2 = ln(h, lyr["ln2_g"], lyr["ln2_b"])
        ff = jnp.maximum(xn2 @ f32(lyr["w1"]) + lyr["b1"], 0.0)
        h = h + ff @ f32(lyr["w2"]) + lyr["b2"]

    xn = ln(h, params["lnf_g"], params["lnf_b"])
    logits = xn @ f32(params["head_w"]) + params["head_b"]
    pred = logits[:, :, :M]
    tv = jnp.transpose(target, (0, 3, 2, 1))[..., 0]
    loss = jnp.mean((pred - tv) ** 2)
    return pred, loss


# ---------------------------------- main --------------------------------------

if __name__ == "__main__":
    mic_num, tot_timesteps = 4, 32
    n_embd, n_hidden, n_head, n_layer = 128, 256, 2, 2
    B, T = 2, 16

    key = jax.random.PRNGKey(0)
    pkey, xkey, tkey = jax.random.split(key, 3)
    params = init_params(pkey, mic_num, tot_timesteps, n_embd, n_hidden,
                         n_head, n_layer)
    x = jax.random.normal(xkey, (B, 3, mic_num, T), dtype=jnp.float32)
    target = jax.random.normal(tkey, (B, 3, mic_num, T), dtype=jnp.float32)

    fwd = jax.jit(functools.partial(prediction_model_forward, n_head=n_head))
    predict, loss = fwd(params, x, target)
    jax.block_until_ready((predict, loss))

    # Pure-JAX f32 reference on the same params; only activation precision differs.
    ref_pred, ref_loss = _reference_forward(params, x, target, n_head=n_head)

    assert predict.shape == (B, T, mic_num)
    assert bool(jnp.all(jnp.isfinite(predict))) and bool(jnp.isfinite(loss))
    assert bool(jnp.allclose(predict, ref_pred, atol=3e-2, rtol=3e-2)), float(
        jnp.max(jnp.abs(predict - ref_pred)))
    assert abs(float(loss) - float(ref_loss)) <= 3e-2 * max(1.0, float(ref_loss))
    print("KERNEL_OK")
</pallas_src>

<mosaic_0001>
module attributes {stable_mosaic.version = 11 : i64} {
  func.func @_embed_kernel(%arg0: i32, %arg1: memref<1x16x128xf32, #tpu.memory_space<vmem>>, %arg2: memref<16x128xf32, #tpu.memory_space<vmem>>, %arg3: memref<128x128xbf16, #tpu.memory_space<vmem>>, %arg4: memref<1x128xf32, #tpu.memory_space<vmem>>, %arg5: memref<1x16x128xbf16, #tpu.memory_space<vmem>>) attributes {dimension_semantics = [#tpu.dimension_semantics<parallel>], iteration_bounds = array<i64: 2>, scalar_prefetch = 0 : i64, scratch_operands = 0 : i64, tpu.core_type = #tpu.core_type<tc>, window_params = [{transform_indices = @transform_0, window_bounds = array<i64: 1, 16, 128>}, {pipeline_mode = #tpu.pipeline_mode<synchronous>, transform_indices = @transform_1, window_bounds = array<i64: 16, 128>}, {pipeline_mode = #tpu.pipeline_mode<synchronous>, transform_indices = @transform_2, window_bounds = array<i64: 128, 128>}, {pipeline_mode = #tpu.pipeline_mode<synchronous>, transform_indices = @transform_3, window_bounds = array<i64: 1, 128>}, {transform_indices = @transform_4, window_bounds = array<i64: 1, 16, 128>}]} {
    %c0 = arith.constant 0 : index
    %c0_0 = arith.constant 0 : index
    %c0_1 = arith.constant 0 : index
    %0 = vector.load %arg1[%c0, %c0_0, %c0_1] : memref<1x16x128xf32, #tpu.memory_space<vmem>>, vector<1x16x128xf32>
    %1 = vector.shape_cast %0 : vector<1x16x128xf32> to vector<16x128xf32>
    %2 = arith.truncf %1 : vector<16x128xf32> to vector<16x128xbf16>
    %c0_2 = arith.constant 0 : index
    %c0_3 = arith.constant 0 : index
    %3 = vector.load %arg3[%c0_2, %c0_3] : memref<128x128xbf16, #tpu.memory_space<vmem>>, vector<128x128xbf16>
    %cst = arith.constant dense<0.000000e+00> : vector<16x128xf32>
    %4 = tpu.matmul %2, %3, %cst {dimension_numbers = #tpu.dot_dimension_numbers<[1], [0], [0], [1], [0, 0, 1, 1], [], []>} : vector<16x128xbf16>, vector<128x128xbf16>, vector<16x128xf32> -> vector<16x128xf32>
    %c0_4 = arith.constant 0 : index
    %c0_5 = arith.constant 0 : index
    %5 = vector.load %arg4[%c0_4, %c0_5] : memref<1x128xf32, #tpu.memory_space<vmem>>, vector<1x128xf32>
    %6 = vector.broadcast %5 : vector<1x128xf32> to vector<16x128xf32>
    %7 = arith.addf %4, %6 : vector<16x128xf32>
    %c0_6 = arith.constant 0 : index
    %c0_7 = arith.constant 0 : index
    %8 = vector.load %arg2[%c0_6, %c0_7] : memref<16x128xf32, #tpu.memory_space<vmem>>, vector<16x128xf32>
    %9 = arith.addf %7, %8 : vector<16x128xf32>
    %10 = arith.truncf %9 : vector<16x128xf32> to vector<16x128xbf16>
    %c0_8 = arith.constant 0 : index
    %c0_9 = arith.constant 0 : index
    %c0_10 = arith.constant 0 : index
    %11 = vector.load %arg5[%c0_8, %c0_9, %c0_10] : memref<1x16x128xbf16, #tpu.memory_space<vmem>>, vector<1x16x128xbf16>
    %12 = vector.shape_cast %11 : vector<1x16x128xbf16> to vector<16x128xbf16>
    %13 = vector.shape_cast %10 : vector<16x128xbf16> to vector<1x16x128xbf16>
    tpu.vector_store %arg5[%c0_8, %c0_9, %c0_10], %13 {strides = array<i32>} : memref<1x16x128xbf16, #tpu.memory_space<vmem>>, vector<1x16x128xbf16>,
    return
  }
  func.func @transform_0(%arg0: i32) -> (i32, i32, i32) {
    %c0_i32 = arith.constant 0 : i32
    %c0_i32_0 = arith.constant 0 : i32
    %c0_i32_1 = arith.constant 0 : i32
    return %arg0, %c0_i32, %c0_i32_0 : i32, i32, i32
  }
  func.func @transform_1(%arg0: i32) -> (i32, i32) {
    %c0_i32 = arith.constant 0 : i32
    %c0_i32_0 = arith.constant 0 : i32
    %c0_i32_1 = arith.constant 0 : i32
    return %c0_i32, %c0_i32_0 : i32, i32
  }
  func.func @transform_2(%arg0: i32) -> (i32, i32) {
    %c0_i32 = arith.constant 0 : i32
    %c0_i32_0 = arith.constant 0 : i32
    %c0_i32_1 = arith.constant 0 : i32
    return %c0_i32, %c0_i32_0 : i32, i32
  }
  func.func @transform_3(%arg0: i32) -> (i32, i32) {
    %c0_i32 = arith.constant 0 : i32
    %c0_i32_0 = arith.constant 0 : i32
    %c0_i32_1 = arith.constant 0 : i32
    return %c0_i32, %c0_i32_0 : i32, i32
  }
  func.func @transform_4(%arg0: i32) -> (i32, i32, i32) {
    %c0_i32 = arith.constant 0 : i32
    %c0_i32_0 = arith.constant 0 : i32
    %c0_i32_1 = arith.constant 0 : i32
    return %arg0, %c0_i32, %c0_i32_0 : i32, i32, i32
  }
}

module attributes {stable_mosaic.version = 11 : i64} {
  func.func @_block_kernel(%arg0: i32, %arg1: memref<1x16x128xbf16, #tpu.memory_space<vmem>>, %arg2: memref<1x128xf32, #tpu.memory_space<vmem>>, %arg3: memref<1x128xf32, #tpu.memory_space<vmem>>, %arg4: memref<3x2x128x64xbf16, #tpu.memory_space<vmem>>, %arg5: memref<3x2x1x64xf32, #tpu.memory_space<vmem>>, %arg6: memref<2x64x128xbf16, #tpu.memory_space<vmem>>, %arg7: memref<1x128xf32, #tpu.memory_space<vmem>>, %arg8: memref<1x128xf32, #tpu.memory_space<vmem>>, %arg9: memref<1x128xf32, #tpu.memory_space<vmem>>, %arg10: memref<128x256xbf16, #tpu.memory_space<vmem>>, %arg11: memref<1x256xf32, #tpu.memory_space<vmem>>, %arg12: memref<256x128xbf16, #tpu.memory_space<vmem>>, %arg13: memref<1x128xf32, #tpu.memory_space<vmem>>, %arg14: memref<1x16x128xbf16, #tpu.memory_space<vmem>>) attributes {dimension_semantics = [#tpu.dimension_semantics<parallel>], iteration_bounds = array<i64: 2>, scalar_prefetch = 0 : i64, scratch_operands = 0 : i64, tpu.core_type = #tpu.core_type<tc>, window_params = [{transform_indices = @transform_0, window_bounds = array<i64: 1, 16, 128>}, {pipeline_mode = #tpu.pipeline_mode<synchronous>, transform_indices = @transform_1, window_bounds = array<i64: 1, 128>}, {pipeline_mode = #tpu.pipeline_mode<synchronous>, transform_indices = @transform_2, window_bounds = array<i64: 1, 128>}, {pipeline_mode = #tpu.pipeline_mode<synchronous>, transform_indices = @transform_3, window_bounds = array<i64: 3, 2, 128, 64>}, {pipeline_mode = #tpu.pipeline_mode<synchronous>, transform_indices = @transform_4, window_bounds = array<i64: 3, 2, 1, 64>}, {pipeline_mode = #tpu.pipeline_mode<synchronous>, transform_indices = @transform_5, window_bounds = array<i64: 2, 64, 128>}, {pipeline_mode = #tpu.pipeline_mode<synchronous>, transform_indices = @transform_6, window_bounds = array<i64: 1, 128>}, {pipeline_mode = #tpu.pipeline_mode<synchronous>, transform_indices = @transform_7, window_bounds = array<i64: 1, 128>}, {pipeline_mode = #tpu.pipeline_mode<synchronous>, transform_indices = @transform_8, window_bounds = array<i64: 1, 128>}, {pipeline_mode = #tpu.pipeline_mode<synchronous>, transform_indices = @transform_9, window_bounds = array<i64: 128, 256>}, {pipeline_mode = #tpu.pipeline_mode<synchronous>, transform_indices = @transform_10, window_bounds = array<i64: 1, 256>}, {pipeline_mode = #tpu.pipeline_mode<synchronous>, transform_indices = @transform_11, window_bounds = array<i64: 256, 128>}, {pipeline_mode = #tpu.pipeline_mode<synchronous>, transform_indices = @transform_12, window_bounds = array<i64: 1, 128>}, {transform_indices = @transform_13, window_bounds = array<i64: 1, 16, 128>}]} {
    %c0 = arith.constant 0 : index
    %c0_0 = arith.constant 0 : index
    %c0_1 = arith.constant 0 : index
    %0 = vector.load %arg1[%c0, %c0_0, %c0_1] : memref<1x16x128xbf16, #tpu.memory_space<vmem>>, vector<1x16x128xbf16>
    %1 = vector.shape_cast %0 : vector<1x16x128xbf16> to vector<16x128xbf16>
    %2 = arith.extf %1 : vector<16x128xbf16> to vector<16x128xf32>
    %c0_2 = arith.constant 0 : index
    %c0_3 = arith.constant 0 : index
    %3 = vector.load %arg2[%c0_2, %c0_3] : memref<1x128xf32, #tpu.memory_space<vmem>>, vector<1x128xf32>
    %c0_4 = arith.constant 0 : index
    %c0_5 = arith.constant 0 : index
    %4 = vector.load %arg3[%c0_4, %c0_5] : memref<1x128xf32, #tpu.memory_space<vmem>>, vector<1x128xf32>
    %cst = arith.constant dense<0.000000e+00> : vector<16xf32>
    %5 = vector.multi_reduction <add>, %2, %cst [1] : vector<16x128xf32> to vector<16xf32>
    %6 = vector.shape_cast %5 : vector<16xf32> to vector<16x1xf32>
    %cst_6 = arith.constant 1.280000e+02 : f32
    %7 = vector.broadcast %cst_6 : f32 to vector<16x1xf32>
    %8 = arith.divf %6, %7 : vector<16x1xf32>
    %9 = vector.broadcast %8 : vector<16x1xf32> to vector<16x128xf32>
    %10 = arith.subf %2, %9 : vector<16x128xf32>
    %11 = arith.mulf %10, %10 : vector<16x128xf32>
    %cst_7 = arith.constant dense<0.000000e+00> : vector<16xf32>
    %12 = vector.multi_reduction <add>, %11, %cst_7 [1] : vector<16x128xf32> to vector<16xf32>
    %13 = vector.shape_cast %12 : vector<16xf32> to vector<16x1xf32>
    %cst_8 = arith.constant 1.280000e+02 : f32
    %14 = vector.broadcast %cst_8 : f32 to vector<16x1xf32>
    %15 = arith.divf %13, %14 : vector<16x1xf32>
    %16 = vector.broadcast %8 : vector<16x1xf32> to vector<16x128xf32>
    %17 = arith.subf %2, %16 : vector<16x128xf32>
    %cst_9 = arith.constant 9.99999974E-6 : f32
    %18 = vector.broadcast %cst_9 : f32 to vector<16x1xf32>
    %19 = arith.addf %15, %18 : vector<16x1xf32>
    %20 = math.rsqrt %19 : vector<16x1xf32>
    %21 = vector.broadcast %20 : vector<16x1xf32> to vector<16x128xf32>
    %22 = arith.mulf %17, %21 : vector<16x128xf32>
    %23 = vector.broadcast %3 : vector<1x128xf32> to vector<16x128xf32>
    %24 = arith.mulf %22, %23 : vector<16x128xf32>
    %25 = vector.broadcast %4 : vector<1x128xf32> to vector<16x128xf32>
    %26 = arith.addf %24, %25 : vector<16x128xf32>
    %27 = arith.truncf %26 : vector<16x128xf32> to vector<16x128xbf16>
    %28 = tpu.iota {dimensions = array<i32: 0>} : vector<16x16xi32>
    %29 = tpu.iota {dimensions = array<i32: 1>} : vector<16x16xi32>
    %30 = arith.cmpi sle, %29, %28 : vector<16x16xi32>
    %c0_10 = arith.constant 0 : index
    %c0_11 = arith.constant 0 : index
    %31 = vector.load %arg7[%c0_10, %c0_11] : memref<1x128xf32, #tpu.memory_space<vmem>>, vector<1x128xf32>
    %32 = vector.broadcast %31 : vector<1x128xf32> to vector<16x128xf32>
    %33 = arith.addf %2, %32 : vector<16x128xf32>
    %c0_12 = arith.constant 0 : index
    %c0_13 = arith.constant 0 : index
    %c0_14 = arith.constant 0 : index
    %c0_15 = arith.constant 0 : index
    %34 = vector.load %arg4[%c0_12, %c0_13, %c0_14, %c0_15] : memref<3x2x128x64xbf16, #tpu.memory_space<vmem>>, vector<1x1x128x64xbf16>
    %35 = vector.shape_cast %34 : vector<1x1x128x64xbf16> to vector<128x64xbf16>
    %cst_16 = arith.constant dense<0.000000e+00> : vector<16x64xf32>
    %36 = tpu.matmul %27, %35, %cst_16 {dimension_numbers = #tpu.dot_dimension_numbers<[1], [0], [0], [1], [0, 0, 1, 1], [], []>} : vector<16x128xbf16>, vector<128x64xbf16>, vector<16x64xf32> -> vector<16x64xf32>
    %c0_17 = arith.constant 0 : index
    %c0_18 = arith.constant 0 : index
    %c0_19 = arith.constant 0 : index
    %c0_20 = arith.constant 0 : index
    %37 = vector.load %arg5[%c0_17, %c0_18, %c0_19, %c0_20] : memref<3x2x1x64xf32, #tpu.memory_space<vmem>>, vector<1x1x1x64xf32>
    %38 = vector.shape_cast %37 : vector<1x1x1x64xf32> to vector<1x64xf32>
    %39 = vector.broadcast %38 : vector<1x64xf32> to vector<16x64xf32>
    %40 = arith.addf %36, %39 : vector<16x64xf32>
    %c1 = arith.constant 1 : index
    %c0_21 = arith.constant 0 : index
    %c0_22 = arith.constant 0 : index
    %c0_23 = arith.constant 0 : index
    %41 = vector.load %arg4[%c1, %c0_21, %c0_22, %c0_23] : memref<3x2x128x64xbf16, #tpu.memory_space<vmem>>, vector<1x1x128x64xbf16>
    %42 = vector.shape_cast %41 : vector<1x1x128x64xbf16> to vector<128x64xbf16>
    %cst_24 = arith.constant dense<0.000000e+00> : vector<16x64xf32>
    %43 = tpu.matmul %27, %42, %cst_24 {dimension_numbers = #tpu.dot_dimension_numbers<[1], [0], [0], [1], [0, 0, 1, 1], [], []>} : vector<16x128xbf16>, vector<128x64xbf16>, vector<16x64xf32> -> vector<16x64xf32>
    %c1_25 = arith.constant 1 : index
    %c0_26 = arith.constant 0 : index
    %c0_27 = arith.constant 0 : index
    %c0_28 = arith.constant 0 : index
    %44 = vector.load %arg5[%c1_25, %c0_26, %c0_27, %c0_28] : memref<3x2x1x64xf32, #tpu.memory_space<vmem>>, vector<1x1x1x64xf32>
    %45 = vector.shape_cast %44 : vector<1x1x1x64xf32> to vector<1x64xf32>
    %46 = vector.broadcast %45 : vector<1x64xf32> to vector<16x64xf32>
    %47 = arith.addf %43, %46 : vector<16x64xf32>
    %c2 = arith.constant 2 : index
    %c0_29 = arith.constant 0 : index
    %c0_30 = arith.constant 0 : index
    %c0_31 = arith.constant 0 : index
    %48 = vector.load %arg4[%c2, %c0_29, %c0_30, %c0_31] : memref<3x2x128x64xbf16, #tpu.memory_space<vmem>>, vector<1x1x128x64xbf16>
    %49 = vector.shape_cast %48 : vector<1x1x128x64xbf16> to vector<128x64xbf16>
    %cst_32 = arith.constant dense<0.000000e+00> : vector<16x64xf32>
    %50 = tpu.matmul %27, %49, %cst_32 {dimension_numbers = #tpu.dot_dimension_numbers<[1], [0], [0], [1], [0, 0, 1, 1], [], []>} : vector<16x128xbf16>, vector<128x64xbf16>, vector<16x64xf32> -> vector<16x64xf32>
    %c2_33 = arith.constant 2 : index
    %c0_34 = arith.constant 0 : index
    %c0_35 = arith.constant 0 : index
    %c0_36 = arith.constant 0 : index
    %51 = vector.load %arg5[%c2_33, %c0_34, %c0_35, %c0_36] : memref<3x2x1x64xf32, #tpu.memory_space<vmem>>, vector<1x1x1x64xf32>
    %52 = vector.shape_cast %51 : vector<1x1x1x64xf32> to vector<1x64xf32>
    %53 = vector.broadcast %52 : vector<1x64xf32> to vector<16x64xf32>
    %54 = arith.addf %50, %53 : vector<16x64xf32>
    %55 = arith.truncf %40 : vector<16x64xf32> to vector<16x64xbf16>
    %56 = arith.truncf %47 : vector<16x64xf32> to vector<16x64xbf16>
    %cst_37 = arith.constant dense<0.000000e+00> : vector<16x16xf32>
    %57 = tpu.matmul %55, %56, %cst_37 {dimension_numbers = #tpu.dot_dimension_numbers<[1], [1], [0], [0], [0, 0, 1, 0], [], []>} : vector<16x64xbf16>, vector<16x64xbf16>, vector<16x16xf32> -> vector<16x16xf32>
    %cst_38 = arith.constant -1.000000e+30 : f32
    %58 = vector.broadcast %cst_38 : f32 to vector<16x16xf32>
    %59 = arith.select %30, %57, %58 : vector<16x16xi1>, vector<16x16xf32>
    %cst_39 = arith.constant dense<0xFF800000> : vector<16xf32>
    %60 = vector.multi_reduction <maximumf>, %59, %cst_39 [1] : vector<16x16xf32> to vector<16xf32>
    %61 = vector.shape_cast %60 : vector<16xf32> to vector<16x1xf32>
    %62 = vector.broadcast %61 : vector<16x1xf32> to vector<16x16xf32>
    %63 = arith.subf %59, %62 : vector<16x16xf32>
    %64 = math.exp %63 : vector<16x16xf32>
    %cst_40 = arith.constant dense<0.000000e+00> : vector<16xf32>
    %65 = vector.multi_reduction <add>, %64, %cst_40 [1] : vector<16x16xf32> to vector<16xf32>
    %66 = vector.shape_cast %65 : vector<16xf32> to vector<16x1xf32>
    %67 = vector.broadcast %66 : vector<16x1xf32> to vector<16x16xf32>
    %68 = arith.divf %64, %67 : vector<16x16xf32>
    %69 = arith.truncf %68 : vector<16x16xf32> to vector<16x16xbf16>
    %70 = arith.truncf %54 : vector<16x64xf32> to vector<16x64xbf16>
    %cst_41 = arith.constant dense<0.000000e+00> : vector<16x64xf32>
    %71 = tpu.matmul %69, %70, %cst_41 {dimension_numbers = #tpu.dot_dimension_numbers<[1], [0], [0], [1], [0, 0, 1, 1], [], []>} : vector<16x16xbf16>, vector<16x64xbf16>, vector<16x64xf32> -> vector<16x64xf32>
    %72 = arith.truncf %71 : vector<16x64xf32> to vector<16x64xbf16>
    %c0_42 = arith.constant 0 : index
    %c0_43 = arith.constant 0 : index
    %c0_44 = arith.constant 0 : index
    %73 = vector.load %arg6[%c0_42, %c0_43, %c0_44] : memref<2x64x128xbf16, #tpu.memory_space<vmem>>, vector<1x64x128xbf16>
    %74 = vector.shape_cast %73 : vector<1x64x128xbf16> to vector<64x128xbf16>
    %cst_45 = arith.constant dense<0.000000e+00> : vector<16x128xf32>
    %75 = tpu.matmul %72, %74, %cst_45 {dimension_numbers = #tpu.dot_dimension_numbers<[1], [0], [0], [1], [0, 0, 1, 1], [], []>} : vector<16x64xbf16>, vector<64x128xbf16>, vector<16x128xf32> -> vector<16x128xf32>
    %76 = arith.addf %33, %75 : vector<16x128xf32>
    %c0_46 = arith.constant 0 : index
    %c1_47 = arith.constant 1 : index
    %c0_48 = arith.constant 0 : index
    %c0_49 = arith.constant 0 : index
    %77 = vector.load %arg4[%c0_46, %c1_47, %c0_48, %c0_49] : memref<3x2x128x64xbf16, #tpu.memory_space<vmem>>, vector<1x1x128x64xbf16>
    %78 = vector.shape_cast %77 : vector<1x1x128x64xbf16> to vector<128x64xbf16>
    %cst_50 = arith.constant dense<0.000000e+00> : vector<16x64xf32>
    %79 = tpu.matmul %27, %78, %cst_50 {dimension_numbers = #tpu.dot_dimension_numbers<[1], [0], [0], [1], [0, 0, 1, 1], [], []>} : vector<16x128xbf16>, vector<128x64xbf16>, vector<16x64xf32> -> vector<16x64xf32>
    %c0_51 = arith.constant 0 : index
    %c1_52 = arith.constant 1 : index
    %c0_53 = arith.constant 0 : index
    %c0_54 = arith.constant 0 : index
    %80 = vector.load %arg5[%c0_51, %c1_52, %c0_53, %c0_54] : memref<3x2x1x64xf32, #tpu.memory_space<vmem>>, vector<1x1x1x64xf32>
    %81 = vector.shape_cast %80 : vector<1x1x1x64xf32> to vector<1x64xf32>
    %82 = vector.broadcast %81 : vector<1x64xf32> to vector<16x64xf32>
    %83 = arith.addf %79, %82 : vector<16x64xf32>
    %c1_55 = arith.constant 1 : index
    %c1_56 = arith.constant 1 : index
    %c0_57 = arith.constant 0 : index
    %c0_58 = arith.constant 0 : index
    %84 = vector.load %arg4[%c1_55, %c1_56, %c0_57, %c0_58] : memref<3x2x128x64xbf16, #tpu.memory_space<vmem>>, vector<1x1x128x64xbf16>
    %85 = vector.shape_cast %84 : vector<1x1x128x64xbf16> to vector<128x64xbf16>
    %cst_59 = arith.constant dense<0.000000e+00> : vector<16x64xf32>
    %86 = tpu.matmul %27, %85, %cst_59 {dimension_numbers = #tpu.dot_dimension_numbers<[1], [0], [0], [1], [0, 0, 1, 1], [], []>} : vector<16x128xbf16>, vector<128x64xbf16>, vector<16x64xf32> -> vector<16x64xf32>
    %c1_60 = arith.constant 1 : index
    %c1_61 = arith.constant 1 : index
    %c0_62 = arith.constant 0 : index
    %c0_63 = arith.constant 0 : index
    %87 = vector.load %arg5[%c1_60, %c1_61, %c0_62, %c0_63] : memref<3x2x1x64xf32, #tpu.memory_space<vmem>>, vector<1x1x1x64xf32>
    %88 = vector.shape_cast %87 : vector<1x1x1x64xf32> to vector<1x64xf32>
    %89 = vector.broadcast %88 : vector<1x64xf32> to vector<16x64xf32>
    %90 = arith.addf %86, %89 : vector<16x64xf32>
    %c2_64 = arith.constant 2 : index
    %c1_65 = arith.constant 1 : index
    %c0_66 = arith.constant 0 : index
    %c0_67 = arith.constant 0 : index
    %91 = vector.load %arg4[%c2_64, %c1_65, %c0_66, %c0_67] : memref<3x2x128x64xbf16, #tpu.memory_space<vmem>>, vector<1x1x128x64xbf16>
    %92 = vector.shape_cast %91 : vector<1x1x128x64xbf16> to vector<128x64xbf16>
    %cst_68 = arith.constant dense<0.000000e+00> : vector<16x64xf32>
    %93 = tpu.matmul %27, %92, %cst_68 {dimension_numbers = #tpu.dot_dimension_numbers<[1], [0], [0], [1], [0, 0, 1, 1], [], []>} : vector<16x128xbf16>, vector<128x64xbf16>, vector<16x64xf32> -> vector<16x64xf32>
    %c2_69 = arith.constant 2 : index
    %c1_70 = arith.constant 1 : index
    %c0_71 = arith.constant 0 : index
    %c0_72 = arith.constant 0 : index
    %94 = vector.load %arg5[%c2_69, %c1_70, %c0_71, %c0_72] : memref<3x2x1x64xf32, #tpu.memory_space<vmem>>, vector<1x1x1x64xf32>
    %95 = vector.shape_cast %94 : vector<1x1x1x64xf32> to vector<1x64xf32>
    %96 = vector.broadcast %95 : vector<1x64xf32> to vector<16x64xf32>
    %97 = arith.addf %93, %96 : vector<16x64xf32>
    %98 = arith.truncf %83 : vector<16x64xf32> to vector<16x64xbf16>
    %99 = arith.truncf %90 : vector<16x64xf32> to vector<16x64xbf16>
    %cst_73 = arith.constant dense<0.000000e+00> : vector<16x16xf32>
    %100 = tpu.matmul %98, %99, %cst_73 {dimension_numbers = #tpu.dot_dimension_numbers<[1], [1], [0], [0], [0, 0, 1, 0], [], []>} : vector<16x64xbf16>, vector<16x64xbf16>, vector<16x16xf32> -> vector<16x16xf32>
    %cst_74 = arith.constant -1.000000e+30 : f32
    %101 = vector.broadcast %cst_74 : f32 to vector<16x16xf32>
    %102 = arith.select %30, %100, %101 : vector<16x16xi1>, vector<16x16xf32>
    %cst_75 = arith.constant dense<0xFF800000> : vector<16xf32>
    %103 = vector.multi_reduction <maximumf>, %102, %cst_75 [1] : vector<16x16xf32> to vector<16xf32>
    %104 = vector.shape_cast %103 : vector<16xf32> to vector<16x1xf32>
    %105 = vector.broadcast %104 : vector<16x1xf32> to vector<16x16xf32>
    %106 = arith.subf %102, %105 : vector<16x16xf32>
    %107 = math.exp %106 : vector<16x16xf32>
    %cst_76 = arith.constant dense<0.000000e+00> : vector<16xf32>
    %108 = vector.multi_reduction <add>, %107, %cst_76 [1] : vector<16x16xf32> to vector<16xf32>
    %109 = vector.shape_cast %108 : vector<16xf32> to vector<16x1xf32>
    %110 = vector.broadcast %109 : vector<16x1xf32> to vector<16x16xf32>
    %111 = arith.divf %107, %110 : vector<16x16xf32>
    %112 = arith.truncf %111 : vector<16x16xf32> to vector<16x16xbf16>
    %113 = arith.truncf %97 : vector<16x64xf32> to vector<16x64xbf16>
    %cst_77 = arith.constant dense<0.000000e+00> : vector<16x64xf32>
    %114 = tpu.matmul %112, %113, %cst_77 {dimension_numbers = #tpu.dot_dimension_numbers<[1], [0], [0], [1], [0, 0, 1, 1], [], []>} : vector<16x16xbf16>, vector<16x64xbf16>, vector<16x64xf32> -> vector<16x64xf32>
    %115 = arith.truncf %114 : vector<16x64xf32> to vector<16x64xbf16>
    %c1_78 = arith.constant 1 : index
    %c0_79 = arith.constant 0 : index
    %c0_80 = arith.constant 0 : index
    %116 = vector.load %arg6[%c1_78, %c0_79, %c0_80] : memref<2x64x128xbf16, #tpu.memory_space<vmem>>, vector<1x64x128xbf16>
    %117 = vector.shape_cast %116 : vector<1x64x128xbf16> to vector<64x128xbf16>
    %cst_81 = arith.constant dense<0.000000e+00> : vector<16x128xf32>
    %118 = tpu.matmul %115, %117, %cst_81 {dimension_numbers = #tpu.dot_dimension_numbers<[1], [0], [0], [1], [0, 0, 1, 1], [], []>} : vector<16x64xbf16>, vector<64x128xbf16>, vector<16x128xf32> -> vector<16x128xf32>
    %119 = arith.addf %76, %118 : vector<16x128xf32>
    %c0_82 = arith.constant 0 : index
    %c0_83 = arith.constant 0 : index
    %120 = vector.load %arg8[%c0_82, %c0_83] : memref<1x128xf32, #tpu.memory_space<vmem>>, vector<1x128xf32>
    %c0_84 = arith.constant 0 : index
    %c0_85 = arith.constant 0 : index
    %121 = vector.load %arg9[%c0_84, %c0_85] : memref<1x128xf32, #tpu.memory_space<vmem>>, vector<1x128xf32>
    %cst_86 = arith.constant dense<0.000000e+00> : vector<16xf32>
    %122 = vector.multi_reduction <add>, %119, %cst_86 [1] : vector<16x128xf32> to vector<16xf32>
    %123 = vector.shape_cast %122 : vector<16xf32> to vector<16x1xf32>
    %cst_87 = arith.constant 1.280000e+02 : f32
    %124 = vector.broadcast %cst_87 : f32 to vector<16x1xf32>
    %125 = arith.divf %123, %124 : vector<16x1xf32>
    %126 = vector.broadcast %125 : vector<16x1xf32> to vector<16x128xf32>
    %127 = arith.subf %119, %126 : vector<16x128xf32>
    %128 = arith.mulf %127, %127 : vector<16x128xf32>
    %cst_88 = arith.constant dense<0.000000e+00> : vector<16xf32>
    %129 = vector.multi_reduction <add>, %128, %cst_88 [1] : vector<16x128xf32> to vector<16xf32>
    %130 = vector.shape_cast %129 : vector<16xf32> to vector<16x1xf32>
    %cst_89 = arith.constant 1.280000e+02 : f32
    %131 = vector.broadcast %cst_89 : f32 to vector<16x1xf32>
    %132 = arith.divf %130, %131 : vector<16x1xf32>
    %133 = vector.broadcast %125 : vector<16x1xf32> to vector<16x128xf32>
    %134 = arith.subf %119, %133 : vector<16x128xf32>
    %cst_90 = arith.constant 9.99999974E-6 : f32
    %135 = vector.broadcast %cst_90 : f32 to vector<16x1xf32>
    %136 = arith.addf %132, %135 : vector<16x1xf32>
    %137 = math.rsqrt %136 : vector<16x1xf32>
    %138 = vector.broadcast %137 : vector<16x1xf32> to vector<16x128xf32>
    %139 = arith.mulf %134, %138 : vector<16x128xf32>
    %140 = vector.broadcast %120 : vector<1x128xf32> to vector<16x128xf32>
    %141 = arith.mulf %139, %140 : vector<16x128xf32>
    %142 = vector.broadcast %121 : vector<1x128xf32> to vector<16x128xf32>
    %143 = arith.addf %141, %142 : vector<16x128xf32>
    %144 = arith.truncf %143 : vector<16x128xf32> to vector<16x128xbf16>
    %c0_91 = arith.constant 0 : index
    %c0_92 = arith.constant 0 : index
    %145 = vector.load %arg10[%c0_91, %c0_92] : memref<128x256xbf16, #tpu.memory_space<vmem>>, vector<128x256xbf16>
    %cst_93 = arith.constant dense<0.000000e+00> : vector<16x256xf32>
    %146 = tpu.matmul %144, %145, %cst_93 {dimension_numbers = #tpu.dot_dimension_numbers<[1], [0], [0], [1], [0, 0, 1, 1], [], []>} : vector<16x128xbf16>, vector<128x256xbf16>, vector<16x256xf32> -> vector<16x256xf32>
    %c0_94 = arith.constant 0 : index
    %c0_95 = arith.constant 0 : index
    %147 = vector.load %arg11[%c0_94, %c0_95] : memref<1x256xf32, #tpu.memory_space<vmem>>, vector<1x256xf32>
    %148 = vector.broadcast %147 : vector<1x256xf32> to vector<16x256xf32>
    %149 = arith.addf %146, %148 : vector<16x256xf32>
    %cst_96 = arith.constant 0.000000e+00 : f32
    %150 = vector.broadcast %cst_96 : f32 to vector<16x256xf32>
    %151 = arith.maximumf %149, %150 : vector<16x256xf32>
    %152 = arith.truncf %151 : vector<16x256xf32> to vector<16x256xbf16>
    %c0_97 = arith.constant 0 : index
    %c0_98 = arith.constant 0 : index
    %153 = vector.load %arg12[%c0_97, %c0_98] : memref<256x128xbf16, #tpu.memory_space<vmem>>, vector<256x128xbf16>
    %cst_99 = arith.constant dense<0.000000e+00> : vector<16x128xf32>
    %154 = tpu.matmul %152, %153, %cst_99 {dimension_numbers = #tpu.dot_dimension_numbers<[1], [0], [0], [1], [0, 0, 1, 1], [], []>} : vector<16x256xbf16>, vector<256x128xbf16>, vector<16x128xf32> -> vector<16x128xf32>
    %155 = arith.addf %119, %154 : vector<16x128xf32>
    %c0_100 = arith.constant 0 : index
    %c0_101 = arith.constant 0 : index
    %156 = vector.load %arg13[%c0_100, %c0_101] : memref<1x128xf32, #tpu.memory_space<vmem>>, vector<1x128xf32>
    %157 = vector.broadcast %156 : vector<1x128xf32> to vector<16x128xf32>
    %158 = arith.addf %155, %157 : vector<16x128xf32>
    %159 = arith.truncf %158 : vector<16x128xf32> to vector<16x128xbf16>
    %c0_102 = arith.constant 0 : index
    %c0_103 = arith.constant 0 : index
    %c0_104 = arith.constant 0 : index
    %160 = vector.load %arg14[%c0_102, %c0_103, %c0_104] : memref<1x16x128xbf16, #tpu.memory_space<vmem>>, vector<1x16x128xbf16>
    %161 = vector.shape_cast %160 : vector<1x16x128xbf16> to vector<16x128xbf16>
    %162 = vector.shape_cast %159 : vector<16x128xbf16> to vector<1x16x128xbf16>
    tpu.vector_store %arg14[%c0_102, %c0_103, %c0_104], %162 {strides = array<i32>} : memref<1x16x128xbf16, #tpu.memory_space<vmem>>, vector<1x16x128xbf16>,
    return
  }
  func.func @transform_0(%arg0: i32) -> (i32, i32, i32) {
    %c0_i32 = arith.constant 0 : i32
    %c0_i32_0 = arith.constant 0 : i32
    %c0_i32_1 = arith.constant 0 : i32
    return %arg0, %c0_i32, %c0_i32_0 : i32, i32, i32
  }
  func.func @transform_1(%arg0: i32) -> (i32, i32) {
    %c0_i32 = arith.constant 0 : i32
    %c0_i32_0 = arith.constant 0 : i32
    %c0_i32_1 = arith.constant 0 : i32
    return %c0_i32, %c0_i32_0 : i32, i32
  }
  func.func @transform_2(%arg0: i32) -> (i32, i32) {
    %c0_i32 = arith.constant 0 : i32
    %c0_i32_0 = arith.constant 0 : i32
    %c0_i32_1 = arith.constant 0 : i32
    return %c0_i32, %c0_i32_0 : i32, i32
  }
  func.func @transform_3(%arg0: i32) -> (i32, i32, i32, i32) {
    %c0_i32 = arith.constant 0 : i32
    %c0_i32_0 = arith.constant 0 : i32
    %c0_i32_1 = arith.constant 0 : i32
    %c0_i32_2 = arith.constant 0 : i32
    %c0_i32_3 = arith.constant 0 : i32
    return %c0_i32, %c0_i32_0, %c0_i32_1, %c0_i32_2 : i32, i32, i32, i32
  }
  func.func @transform_4(%arg0: i32) -> (i32, i32, i32, i32) {
    %c0_i32 = arith.constant 0 : i32
    %c0_i32_0 = arith.constant 0 : i32
    %c0_i32_1 = arith.constant 0 : i32
    %c0_i32_2 = arith.constant 0 : i32
    %c0_i32_3 = arith.constant 0 : i32
    return %c0_i32, %c0_i32_0, %c0_i32_1, %c0_i32_2 : i32, i32, i32, i32
  }
  func.func @transform_5(%arg0: i32) -> (i32, i32, i32) {
    %c0_i32 = arith.constant 0 : i32
    %c0_i32_0 = arith.constant 0 : i32
    %c0_i32_1 = arith.constant 0 : i32
    %c0_i32_2 = arith.constant 0 : i32
    return %c0_i32, %c0_i32_0, %c0_i32_1 : i32, i32, i32
  }
  func.func @transform_6(%arg0: i32) -> (i32, i32) {
    %c0_i32 = arith.constant 0 : i32
    %c0_i32_0 = arith.constant 0 : i32
    %c0_i32_1 = arith.constant 0 : i32
    return %c0_i32, %c0_i32_0 : i32, i32
  }
  func.func @transform_7(%arg0: i32) -> (i32, i32) {
    %c0_i32 = arith.constant 0 : i32
    %c0_i32_0 = arith.constant 0 : i32
    %c0_i32_1 = arith.constant 0 : i32
    return %c0_i32, %c0_i32_0 : i32, i32
  }
  func.func @transform_8(%arg0: i32) -> (i32, i32) {
    %c0_i32 = arith.constant 0 : i32
    %c0_i32_0 = arith.constant 0 : i32
    %c0_i32_1 = arith.constant 0 : i32
    return %c0_i32, %c0_i32_0 : i32, i32
  }
  func.func @transform_9(%arg0: i32) -> (i32, i32) {
    %c0_i32 = arith.constant 0 : i32
    %c0_i32_0 = arith.constant 0 : i32
    %c0_i32_1 = arith.constant 0 : i32
    return %c0_i32, %c0_i32_0 : i32, i32
  }
  func.func @transform_10(%arg0: i32) -> (i32, i32) {
    %c0_i32 = arith.constant 0 : i32
    %c0_i32_0 = arith.constant 0 : i32
    %c0_i32_1 = arith.constant 0 : i32
    return %c0_i32, %c0_i32_0 : i32, i32
  }
  func.func @transform_11(%arg0: i32) -> (i32, i32) {
    %c0_i32 = arith.constant 0 : i32
    %c0_i32_0 = arith.constant 0 : i32
    %c0_i32_1 = arith.constant 0 : i32
    return %c0_i32, %c0_i32_0 : i32, i32
  }
  func.func @transform_12(%arg0: i32) -> (i32, i32) {
    %c0_i32 = arith.constant 0 : i32
    %c0_i32_0 = arith.constant 0 : i32
    %c0_i32_1 = arith.constant 0 : i32
    return %c0_i32, %c0_i32_0 : i32, i32
  }
  func.func @transform_13(%arg0: i32) -> (i32, i32, i32) {
    %c0_i32 = arith.constant 0 : i32
    %c0_i32_0 = arith.constant 0 : i32
    %c0_i32_1 = arith.constant 0 : i32
    return %arg0, %c0_i32, %c0_i32_0 : i32, i32, i32
  }
}

module attributes {stable_mosaic.version = 11 : i64} {
  func.func @_head_loss_kernel(%arg0: i32, %arg1: memref<1x16x128xbf16, #tpu.memory_space<vmem>>, %arg2: memref<1x128xf32, #tpu.memory_space<vmem>>, %arg3: memref<1x128xf32, #tpu.memory_space<vmem>>, %arg4: memref<128x128xbf16, #tpu.memory_space<vmem>>, %arg5: memref<1x128xf32, #tpu.memory_space<vmem>>, %arg6: memref<1x16x128xf32, #tpu.memory_space<vmem>>, %arg7: memref<1x16x128xf32, #tpu.memory_space<vmem>>, %arg8: memref<1x1x128xf32, #tpu.memory_space<vmem>>) attributes {dimension_semantics = [#tpu.dimension_semantics<parallel>], iteration_bounds = array<i64: 2>, scalar_prefetch = 0 : i64, scratch_operands = 0 : i64, tpu.core_type = #tpu.core_type<tc>, window_params = [{transform_indices = @transform_0, window_bounds = array<i64: 1, 16, 128>}, {pipeline_mode = #tpu.pipeline_mode<synchronous>, transform_indices = @transform_1, window_bounds = array<i64: 1, 128>}, {pipeline_mode = #tpu.pipeline_mode<synchronous>, transform_indices = @transform_2, window_bounds = array<i64: 1, 128>}, {pipeline_mode = #tpu.pipeline_mode<synchronous>, transform_indices = @transform_3, window_bounds = array<i64: 128, 128>}, {pipeline_mode = #tpu.pipeline_mode<synchronous>, transform_indices = @transform_4, window_bounds = array<i64: 1, 128>}, {transform_indices = @transform_5, window_bounds = array<i64: 1, 16, 128>}, {transform_indices = @transform_6, window_bounds = array<i64: 1, 16, 128>}, {transform_indices = @transform_7, window_bounds = array<i64: 1, 1, 128>}]} {
    %c0 = arith.constant 0 : index
    %c0_0 = arith.constant 0 : index
    %c0_1 = arith.constant 0 : index
    %0 = vector.load %arg1[%c0, %c0_0, %c0_1] : memref<1x16x128xbf16, #tpu.memory_space<vmem>>, vector<1x16x128xbf16>
    %1 = vector.shape_cast %0 : vector<1x16x128xbf16> to vector<16x128xbf16>
    %2 = arith.extf %1 : vector<16x128xbf16> to vector<16x128xf32>
    %cst = arith.constant dense<0.000000e+00> : vector<16xf32>
    %3 = vector.multi_reduction <add>, %2, %cst [1] : vector<16x128xf32> to vector<16xf32>
    %4 = vector.shape_cast %3 : vector<16xf32> to vector<16x1xf32>
    %cst_2 = arith.constant 1.280000e+02 : f32
    %5 = vector.broadcast %cst_2 : f32 to vector<16x1xf32>
    %6 = arith.divf %4, %5 : vector<16x1xf32>
    %7 = vector.broadcast %6 : vector<16x1xf32> to vector<16x128xf32>
    %8 = arith.subf %2, %7 : vector<16x128xf32>
    %9 = arith.mulf %8, %8 : vector<16x128xf32>
    %cst_3 = arith.constant dense<0.000000e+00> : vector<16xf32>
    %10 = vector.multi_reduction <add>, %9, %cst_3 [1] : vector<16x128xf32> to vector<16xf32>
    %11 = vector.shape_cast %10 : vector<16xf32> to vector<16x1xf32>
    %cst_4 = arith.constant 1.280000e+02 : f32
    %12 = vector.broadcast %cst_4 : f32 to vector<16x1xf32>
    %13 = arith.divf %11, %12 : vector<16x1xf32>
    %14 = vector.broadcast %6 : vector<16x1xf32> to vector<16x128xf32>
    %15 = arith.subf %2, %14 : vector<16x128xf32>
    %cst_5 = arith.constant 9.99999974E-6 : f32
    %16 = vector.broadcast %cst_5 : f32 to vector<16x1xf32>
    %17 = arith.addf %13, %16 : vector<16x1xf32>
    %18 = math.rsqrt %17 : vector<16x1xf32>
    %19 = vector.broadcast %18 : vector<16x1xf32> to vector<16x128xf32>
    %20 = arith.mulf %15, %19 : vector<16x128xf32>
    %c0_6 = arith.constant 0 : index
    %c0_7 = arith.constant 0 : index
    %21 = vector.load %arg2[%c0_6, %c0_7] : memref<1x128xf32, #tpu.memory_space<vmem>>, vector<1x128xf32>
    %22 = vector.broadcast %21 : vector<1x128xf32> to vector<16x128xf32>
    %23 = arith.mulf %20, %22 : vector<16x128xf32>
    %c0_8 = arith.constant 0 : index
    %c0_9 = arith.constant 0 : index
    %24 = vector.load %arg3[%c0_8, %c0_9] : memref<1x128xf32, #tpu.memory_space<vmem>>, vector<1x128xf32>
    %25 = vector.broadcast %24 : vector<1x128xf32> to vector<16x128xf32>
    %26 = arith.addf %23, %25 : vector<16x128xf32>
    %27 = arith.truncf %26 : vector<16x128xf32> to vector<16x128xbf16>
    %c0_10 = arith.constant 0 : index
    %c0_11 = arith.constant 0 : index
    %28 = vector.load %arg4[%c0_10, %c0_11] : memref<128x128xbf16, #tpu.memory_space<vmem>>, vector<128x128xbf16>
    %cst_12 = arith.constant dense<0.000000e+00> : vector<16x128xf32>
    %29 = tpu.matmul %27, %28, %cst_12 {dimension_numbers = #tpu.dot_dimension_numbers<[1], [0], [0], [1], [0, 0, 1, 1], [], []>} : vector<16x128xbf16>, vector<128x128xbf16>, vector<16x128xf32> -> vector<16x128xf32>
    %c0_13 = arith.constant 0 : index
    %c0_14 = arith.constant 0 : index
    %30 = vector.load %arg5[%c0_13, %c0_14] : memref<1x128xf32, #tpu.memory_space<vmem>>, vector<1x128xf32>
    %31 = vector.broadcast %30 : vector<1x128xf32> to vector<16x128xf32>
    %32 = arith.addf %29, %31 : vector<16x128xf32>
    %c0_15 = arith.constant 0 : index
    %c0_16 = arith.constant 0 : index
    %c0_17 = arith.constant 0 : index
    %33 = vector.load %arg7[%c0_15, %c0_16, %c0_17] : memref<1x16x128xf32, #tpu.memory_space<vmem>>, vector<1x16x128xf32>
    %34 = vector.shape_cast %33 : vector<1x16x128xf32> to vector<16x128xf32>
    %35 = vector.shape_cast %32 : vector<16x128xf32> to vector<1x16x128xf32>
    tpu.vector_store %arg7[%c0_15, %c0_16, %c0_17], %35 {strides = array<i32>} : memref<1x16x128xf32, #tpu.memory_space<vmem>>, vector<1x16x128xf32>,
    %c0_18 = arith.constant 0 : index
    %c0_19 = arith.constant 0 : index
    %c0_20 = arith.constant 0 : index
    %36 = vector.load %arg6[%c0_18, %c0_19, %c0_20] : memref<1x16x128xf32, #tpu.memory_space<vmem>>, vector<1x16x128xf32>
    %37 = vector.shape_cast %36 : vector<1x16x128xf32> to vector<16x128xf32>
    %38 = arith.subf %32, %37 : vector<16x128xf32>
    %39 = arith.mulf %38, %38 : vector<16x128xf32>
    %cst_21 = arith.constant dense<0.000000e+00> : vector<16xf32>
    %40 = vector.multi_reduction <add>, %39, %cst_21 [1] : vector<16x128xf32> to vector<16xf32>
    %41 = vector.shape_cast %40 : vector<16xf32> to vector<16x1xf32>
    %cst_22 = arith.constant dense<0.000000e+00> : vector<1xf32>
    %42 = vector.multi_reduction <add>, %41, %cst_22 [0] : vector<16x1xf32> to vector<1xf32>
    %43 = vector.shape_cast %42 : vector<1xf32> to vector<1x1xf32>
    %cst_23 = arith.constant 7.812500e-03 : f32
    %44 = vector.broadcast %cst_23 : f32 to vector<1x1xf32>
    %45 = arith.mulf %43, %44 : vector<1x1xf32>
    %46 = vector.shape_cast %45 : vector<1x1xf32> to vector<1x1xf32>
    %47 = vector.broadcast %46 : vector<1x1xf32> to vector<1x128xf32>
    %c0_24 = arith.constant 0 : index
    %c0_25 = arith.constant 0 : index
    %c0_26 = arith.constant 0 : index
    %48 = vector.load %arg8[%c0_24, %c0_25, %c0_26] : memref<1x1x128xf32, #tpu.memory_space<vmem>>, vector<1x1x128xf32>
    %49 = vector.shape_cast %48 : vector<1x1x128xf32> to vector<1x128xf32>
    %50 = vector.shape_cast %47 : vector<1x128xf32> to vector<1x1x128xf32>
    tpu.vector_store %arg8[%c0_24, %c0_25, %c0_26], %50 {strides = array<i32>} : memref<1x1x128xf32, #tpu.memory_space<vmem>>, vector<1x1x128xf32>,
    return
  }
  func.func @transform_0(%arg0: i32) -> (i32, i32, i32) {
    %c0_i32 = arith.constant 0 : i32
    %c0_i32_0 = arith.constant 0 : i32
    %c0_i32_1 = arith.constant 0 : i32
    return %arg0, %c0_i32, %c0_i32_0 : i32, i32, i32
  }
  func.func @transform_1(%arg0: i32) -> (i32, i32) {
    %c0_i32 = arith.constant 0 : i32
    %c0_i32_0 = arith.constant 0 : i32
    %c0_i32_1 = arith.constant 0 : i32
    return %c0_i32, %c0_i32_0 : i32, i32
  }
  func.func @transform_2(%arg0: i32) -> (i32, i32) {
    %c0_i32 = arith.constant 0 : i32
    %c0_i32_0 = arith.constant 0 : i32
    %c0_i32_1 = arith.constant 0 : i32
    return %c0_i32, %c0_i32_0 : i32, i32
  }
  func.func @transform_3(%arg0: i32) -> (i32, i32) {
    %c0_i32 = arith.constant 0 : i32
    %c0_i32_0 = arith.constant 0 : i32
    %c0_i32_1 = arith.constant 0 : i32
    return %c0_i32, %c0_i32_0 : i32, i32
  }
  func.func @transform_4(%arg0: i32) -> (i32, i32) {
    %c0_i32 = arith.constant 0 : i32
    %c0_i32_0 = arith.constant 0 : i32
    %c0_i32_1 = arith.constant 0 : i32
    return %c0_i32, %c0_i32_0 : i32, i32
  }
  func.func @transform_5(%arg0: i32) -> (i32, i32, i32) {
    %c0_i32 = arith.constant 0 : i32
    %c0_i32_0 = arith.constant 0 : i32
    %c0_i32_1 = arith.constant 0 : i32
    return %arg0, %c0_i32, %c0_i32_0 : i32, i32, i32
  }
  func.func @transform_6(%arg0: i32) -> (i32, i32, i32) {
    %c0_i32 = arith.constant 0 : i32
    %c0_i32_0 = arith.constant 0 : i32
    %c0_i32_1 = arith.constant 0 : i32
    return %arg0, %c0_i32, %c0_i32_0 : i32, i32, i32
  }
  func.func @transform_7(%arg0: i32) -> (i32, i32, i32) {
    %c0_i32 = arith.constant 0 : i32
    %c0_i32_0 = arith.constant 0 : i32
    %c0_i32_1 = arith.constant 0 : i32
    return %arg0, %c0_i32, %c0_i32_0 : i32, i32, i32
  }
}

</mosaic_0001>

<bundles_post_ra>
// kernel: prediction_model_forward.4
= control target key start
LH: loop header
LB: loop body
LE: loop exit
PB: predicated region body
PF: predicated region fallthrough
CT: control target
= control target key end

     0   :  { %9 = vsyncpa [#allocation3], 0  ;;  %s571_s15 = smov 0   ;;  %s623_s0 = inlined_call_operand.vmem [shape: f32[2,16,128], index: 0, kind: input, shape index: {}]   ;;  %s624_s1 = inlined_call_operand.vmem [shape: f32[16,128], index: 1, kind: input, shape index: {}]   ;;  %s625_s2 = inlined_call_operand.hbm [shape: bf16[128,128], index: 2, kind: input, shape index: {}]   ;;  %s626_s3 = inlined_call_operand.vmem [shape: f32[1,128], index: 3, kind: input, shape index: {}]   ;;  %s627_s4 = inlined_call_operand.vmem [shape: bf16[2,16,128], index: 4, kind: output, shape index: {}]  }
   0x1 LB: > { %s577_s16 = sadd.s32 4294967295, %s539_s15   ;;  %p412_p0 = scmp.ge.s32.totalorder %s539_s15, 1  ;;  %s539_s15 = sphi %s571_s15, %s15_s15  }
   0x2   : > { %p135_p1 = scmp.lt.s32.totalorder %s539_s15, 3  ;;  %s541_s17 = smov [#allocation2]  }
   0x3   : > { %s150_s18 = sshll.u32 %s541_s17, 4  ;;  %p480_p3 = scmp.eq.s32.totalorder %s577_s16, 0  ;;  %s151_s18 = int_to_ptr.vmem [resolvable:$true] %s150_s18 }
   0x4   : > { %p581_p2 = pnand %p412_p0, %p135_p1  ;;  %s514_s20 = scalar_lea.vmem %s151_s18, 1024 }
   0x5   : > { %p515_p7 = scmp.ne.s32.totalorder %s151_s18, %s514_s20  ;;  %p522_p10 = scmp.lt.s32.totalorder %s151_s18, %s151_s18 }
   0x6   : > { %p476_p4 = pneg %p581_p2  ;;  %p523_p11 = scmp.lt.s32.totalorder %s514_s20, %s514_s20 }
   0x8   : > { %p477_p5 = pnand %p480_p3, %p476_p4  ;;  %p524_p12 = por %p523_p11, %p522_p10 }
   0xa   : > { %p505_p6 = pneg %p477_p5 }
   0xc   : > { %p517_p8 = pnand %p515_p7, %p505_p6 }
   0xe   : > { %p518_p9 = pneg %p517_p8 }
  0x10   : > { %p525_p13 = pnand %p524_p12, %p518_p9 }
  0x12   : > { %528 = shalt.err (!%p525_p13)
}
  0x13   : > { %s542_s21 = smov 64   ;;  %s543_s22 = smov 4  }
  0x14   : > { %479 = dma.hbm_to_vmem [thread:$0]  (!%p477_p5), %s625_s2, 1024, %s151_s18, [#allocation3], %s542_s21, %s542_s21, %s543_s22  }
  0x15   : > { %177 = sbr.rel (%p581_p2) target bundleno = 264 (0x108), region = 36 }
  0x1a   : > { %534 = dma.done.wait (%p480_p3), [#allocation3], 1024  }
  0x1b   : > { %536 = vsyncadd (%p480_p3), [#allocation3], 4294966272  ;;  %v544_v0 = vmov 0.0   ;;  %vm545_vm0 = vmmov 0   ;;  %v495_v1 = vld [vmem:[#allocation2 + $0x38] sm:$0xff]   ;;  %v496_v2 = vld [vmem:[#allocation2 + $0x30] sm:$0xff]  }
  0x1c   : > { %452 = vmatprep.subr.bf16.mxu0 %v544_v0  ;;  %468 = vmatprep.mubr.msk.bf16.mxu0 %vm545_vm0, %v544_v0  ;;  %v497_v3 = vld [vmem:[#allocation2 + $0x28] sm:$0xff]   ;;  %v498_v4 = vld [vmem:[#allocation2 + $0x20] sm:$0xff]   ;;  %p203_p0 = scmp.lt.s32.totalorder %s577_s16, 1  ;;  %v499_v5 = vld [vmem:[#allocation2 + $0x18] sm:$0xff]  }
  0x1d   : > { %453 = vmatpush3.bf16.msra.mxu0 %v495_v1  ;;  %v500_v6 = vld [vmem:[#allocation2 + $0x10] sm:$0xff]   ;;  %v501_v7 = vld [vmem:[#allocation2 + $0x8] sm:$0xff]   ;;  %v502_v8 = vld [vmem:[#allocation2] sm:$0xff]  }
  0x1e   : > { %454 = vmatprep.subr.bf16.mxu0 %v544_v0  ;;  %s630_s16 = smov (!%p203_p0, %s577_s16), 1  ;;  %v421_v12 = vld [vmem:[%s626_s3] ss:$0 sm:$0xff]  ;;  %v330_v18 = vld [vmem:[%s624_s1 + $0x8] sm:$0xff] }
  0x1f   : > { %s434_s25 = sshll.u32 %s630_s16, 4  ;;  %v329_v16 = vld [vmem:[%s624_s1] sm:$0xff]  ;;  %s435_s9 = sshll.u32 %s630_s16, 3 }
  0x20   : > { %s207_s28 = scalar_lea.vmem %s623_s0, %s434_s25  ;;  %s212_s12 = scalar_lea.vmem %s627_s4, %s435_s9 }
  0x21   : > { %455 = vmatpush3.bf16.msra.mxu0 %v496_v2  ;;  %v214_v9 = vld [vmem:[%s207_s28] sm:$0xff]  ;;  %v215_v10 = vld [vmem:[%s207_s28 + $0x8] sm:$0xff] }
  0x22   : > { %456 = vmatprep.subr.bf16.mxu0 %v544_v0  ;;  %v216_v11 = vpack.c.bf16 %v215_v10, %v214_v9 }
  0x25   : > { %457 = vmatpush3.bf16.msra.mxu0 %v497_v3 }
  0x26   : > { %458 = vmatprep.subr.bf16.mxu0 %v544_v0 }
  0x29   : > { %459 = vmatpush3.bf16.msra.mxu0 %v498_v4 }
  0x2a   : > { %460 = vmatprep.subr.bf16.mxu0 %v544_v0 }
  0x2d   : > { %461 = vmatpush3.bf16.msra.mxu0 %v499_v5 }
  0x2e   : > { %462 = vmatprep.subr.bf16.mxu0 %v544_v0 }
  0x31   : > { %463 = vmatpush3.bf16.msra.mxu0 %v500_v6 }
  0x32   : > { %464 = vmatprep.subr.bf16.mxu0 %v544_v0 }
  0x35   : > { %465 = vmatpush3.bf16.msra.mxu0 %v501_v7 }
  0x36   : > { %466 = vmatprep.subr.bf16.mxu0 %v544_v0 }
  0x39   : > { %467 = vmatpush3.bf16.msra.mxu0 %v502_v8 }
  0x3c   : > { %469 = vmatmul.mubr.bf16.vlgmr.msra.gmra.mxu0 %v216_v11 }
  0xfc   : > { %v322_v13 = vpop.f32.mrf.mxu0 }
  0xfd   : > { %v323_v15 = vadd.f32 %v421_v12, %v322_v13 }
  0xfe   : > { %v470_v14 = vpop.f32.mrf.mxu0 }
  0xff   : > { %v331_v21 = vadd.f32 %v329_v16, %v323_v15 }
 0x100   : > { %v325_v17 = vpop.f32.mrf.mxu0 }
 0x101   : > { %v326_v19 = vadd.f32 %v421_v12, %v325_v17 }
 0x102   : > { %v471_v20 = vpop.f32.mrf.mxu0 }
 0x103   : > { %v332_v22 = vadd.f32 %v330_v18, %v326_v19 }
 0x105   : > { %v441_v23 = vpack.c.bf16 %v332_v22, %v331_v21 }
 0x107   : > { %442 = vst [vmem:[%s212_s12] sm:$0xff] %v441_v23  }
 0x108 PF: > { %s15_s15 = sadd.s32 1, %s539_s15  }
 0x109   : > { %p12_p1 = scmp.ge.s32.totalorder %s15_s15, 4  }
 0x10b   :  { %14 = sbr.rel (!%p12_p1) target bundleno = 1 (0x1), region = 71 }
 0x110   :  { %364 = vsyncpa [#allocation3], 1 }
 0x111   :  { %366 = vsyncpa [#allocation3 + $0x1], 1 }

// kernel: prediction_model_forward.7
= control target key start
LH: loop header
LB: loop body
LE: loop exit
PB: predicated region body
PF: predicated region fallthrough
CT: control target
= control target key end

     0   :  { %s712_s24 = smov 0   ;;  %s773_s0 = inlined_call_operand.vmem [shape: bf16[2,16,128], index: 0, kind: input, shape index: {}]   ;;  %s774_s1 = inlined_call_operand.vmem [shape: f32[1,128], index: 1, kind: input, shape index: {}]   ;;  %s775_s2 = inlined_call_operand.vmem [shape: f32[1,128], index: 2, kind: input, shape index: {}]   ;;  %s776_s3 = inlined_call_operand.vmem [shape: bf16[128,128], index: 3, kind: input, shape index: {}]   ;;  %s777_s4 = inlined_call_operand.vmem [shape: f32[1,128], index: 4, kind: input, shape index: {}]   ;;  %s778_s5 = inlined_call_operand.vmem [shape: f32[2,16,128], index: 5, kind: input, shape index: {}]   ;;  %s779_s6 = inlined_call_operand.vmem [shape: f32[2,16,128], index: 6, kind: output, shape index: {0}]   ;;  %s780_s7 = inlined_call_operand.vmem [shape: f32[2,1,128], index: 7, kind: output, shape index: {1}]  }
   0x1 LB: > { %s580_s25 = sadd.s32 4294967295, %s668_s24   ;;  %p584_p0 = scmp.ge.s32.totalorder %s668_s24, 1  ;;  %s668_s24 = sphi %s712_s24, %s18_s24  }
   0x2   : > { %p250_p1 = scmp.lt.s32.totalorder %s668_s24, 3 }
   0x4   : > { %p251_p2 = pnand %p584_p0, %p250_p1 }
   0x5   : > { %p290_p3 = scmp.lt.s32.totalorder (!%p251_p2), %s580_s25, 1 }
   0x6   : > { %254 = sbr.rel (%p251_p2) target bundleno = 687 (0x2af), region = 44 }
   0xb   : > { %s782_s25 = smov (!%p290_p3, %s580_s25), 1  ;;  %v650_v3 = vld [vmem:[%s776_s3 + $0x38] sm:$0xff]   ;;  %v670_v4 = vmov 0.0   ;;  %v651_v13 = vld [vmem:[%s776_s3 + $0x30] sm:$0xff]   ;;  %v652_v14 = vld [vmem:[%s776_s3 + $0x28] sm:$0xff]   ;;  %vm671_vm0 = vmmov 0  }
   0xc   : > { %s604_s26 = sshll.u32 %s782_s25, 3  ;;  %620 = vmatprep.subr.bf16.mxu0 %v670_v4  ;;  %v653_v15 = vld [vmem:[%s776_s3 + $0x20] sm:$0xff]   ;;  %636 = vmatprep.mubr.msk.bf16.mxu0 %vm671_vm0, %v670_v4  ;;  %v654_v16 = vld [vmem:[%s776_s3 + $0x18] sm:$0xff]   ;;  %v655_v17 = vld [vmem:[%s776_s3 + $0x10] sm:$0xff]   ;;  %s307_s17 = scalar_lea.vmem %s780_s7, %s782_s25 }
   0xd   : > { %s294_s29 = scalar_lea.vmem %s773_s0, %s604_s26  ;;  %621 = vmatpush3.bf16.msra.mxu0 %v650_v3  ;;  %v656_v18 = vld [vmem:[%s776_s3 + $0x8] sm:$0xff]   ;;  %v657_v19 = vld [vmem:[%s776_s3] sm:$0xff]  }
   0xe   : > { %v608_v0 = vld [vmem:[%s294_s29] sm:$0xff]   ;;  %622 = vmatprep.subr.bf16.mxu0 %v670_v4  ;;  %s605_s29 = sshll.u32 %s782_s25, 4 }
   0xf   : > { %v609_v1 = vunpack.c.l.bf16 %v608_v0  ;;  %v610_v2 = vunpack.c.h.bf16 %v608_v0  ;;  %v591_v28 = vld [vmem:[%s774_s1] ss:$0 sm:$0xff]  ;;  %s299_s9 = scalar_lea.vmem %s778_s5, %s605_s29  ;;  %s304_s14 = scalar_lea.vmem %s779_s6, %s605_s29 }
  0x10   : > { %v592_v32 = vld [vmem:[%s775_s2] ss:$0 sm:$0xff]  ;;  %v470_v44 = vld [vmem:[%s299_s9 + $0x8] sm:$0xff] }
  0x11   : > { %313 = vadd.xlane.f32.xlu0 %v609_v1  ;;  %623 = vmatpush3.bf16.msra.mxu0 %v651_v13  ;;  %v593_v37 = vld [vmem:[%s777_s4] ss:$0 sm:$0xff] }
  0x12   : > { %624 = vmatprep.subr.bf16.mxu0 %v670_v4  ;;  %v469_v39 = vld [vmem:[%s299_s9] sm:$0xff] }
  0x15   : > { %315 = vadd.xlane.f32.xlu0 %v610_v2  ;;  %625 = vmatpush3.bf16.msra.mxu0 %v652_v14 }
  0x16   : > { %626 = vmatprep.subr.bf16.mxu0 %v670_v4 }
  0x19   : > { %627 = vmatpush3.bf16.msra.mxu0 %v653_v15 }
  0x1a   : > { %628 = vmatprep.subr.bf16.mxu0 %v670_v4 }
  0x1d   : > { %629 = vmatpush3.bf16.msra.mxu0 %v654_v16 }
  0x1e   : > { %630 = vmatprep.subr.bf16.mxu0 %v670_v4 }
  0x21   : > { %631 = vmatpush3.bf16.msra.mxu0 %v655_v17 }
  0x22   : > { %632 = vmatprep.subr.bf16.mxu0 %v670_v4 }
  0x25   : > { %633 = vmatpush3.bf16.msra.mxu0 %v656_v18 }
  0x26   : > { %634 = vmatprep.subr.bf16.mxu0 %v670_v4 }
  0x29   : > { %635 = vmatpush3.bf16.msra.mxu0 %v657_v19 }
  0x9a   : > { %v314_v5 = vpop.xlane.xlu0 %313 }
  0x9b   : > { %v318_v6 = vmul.f32 0.0078125, %v314_v5 }
  0x9d   : > { %v320_v7 = vsub.f32 %v609_v1, %v318_v6 }
  0x9e   : > { %v316_v8 = vpop.xlane.xlu0 %315 }
  0x9f   : > { %v319_v9 = vmul.f32 0.0078125, %v316_v8  ;;  %v322_v10 = vmul.f32 %v320_v7, %v320_v7 }
  0xa1   : > { %v321_v11 = vsub.f32 %v610_v2, %v319_v9  ;;  %324 = vadd.xlane.f32.xlu1 %v322_v10 }
  0xa3   : > { %v323_v12 = vmul.f32 %v321_v11, %v321_v11 }
  0xa5   : > { %326 = vadd.xlane.f32.xlu1 %v323_v12 }
 0x12a   : > { %v325_v20 = vpop.xlane.xlu1 %324 }
 0x12b   : > { %v328_v21 = vmul.f32 0.0078125, %v325_v20 }
 0x12d   : > { %v330_v22 = vadd.f32 1e-05, %v328_v21 }
 0x12e   : > { %v327_v23 = vpop.xlane.xlu1 %326 }
 0x12f   : > { %658 = vrsqrt.f32 %v330_v22  ;;  %v329_v24 = vmul.f32 0.0078125, %v327_v23 }
 0x131   : > { %v331_v25 = vadd.f32 1e-05, %v329_v24 }
 0x133   : > { %660 = vrsqrt.f32 %v331_v25 }
 0x13c   : > { %v659_v26 = vpop.eup %658 }
 0x13d   : > { %v334_v27 = vmul.f32 %v659_v26, %v320_v7 }
 0x13f   : > { %v343_v31 = vmul.f32 %v591_v28, %v334_v27 }
 0x140   : > { %v661_v29 = vpop.eup %660 }
 0x141   : > { %v335_v30 = vmul.f32 %v661_v29, %v321_v11  ;;  %v352_v34 = vadd.f32 %v592_v32, %v343_v31 }
 0x143   : > { %v344_v33 = vmul.f32 %v591_v28, %v335_v30 }
 0x145   : > { %v353_v35 = vadd.f32 %v592_v32, %v344_v33 }
 0x147   : > { %v354_v36 = vpack.c.bf16 %v353_v35, %v352_v34 }
 0x149   : > { %637 = vmatmul.mubr.bf16.vlgmr.msra.gmra.mxu0 %v354_v36 }
 0x209   : > { %v460_v38 = vpop.f32.mrf.mxu0 }
 0x20a   : > { %v461_v40 = vadd.f32 %v593_v37, %v460_v38 }
 0x20b   : > { %v638_v41 = vpop.f32.mrf.mxu0 }
 0x20c   : > { %467 = vst [vmem:[%s304_s14] sm:$0xff] %v461_v40  ;;  %v471_v42 = vsub.f32 %v461_v40, %v469_v39 }
 0x20d   : > { %v463_v43 = vpop.f32.mrf.mxu0 }
 0x20e   : > { %v464_v45 = vadd.f32 %v593_v37, %v463_v43  ;;  %v473_v46 = vmul.f32 %v471_v42, %v471_v42 }
 0x20f   : > { %v639_v47 = vpop.f32.mrf.mxu0 }
 0x210   : > { %468 = vst [vmem:[%s304_s14 + $0x8] sm:$0xff] %v464_v45  ;;  %475 = vadd.xlane.f32.xlu0 %v473_v46  ;;  %v472_v48 = vsub.f32 %v464_v45, %v470_v44 }
 0x212   : > { %v474_v49 = vmul.f32 %v472_v48, %v472_v48 }
 0x214   : > { %477 = vadd.xlane.f32.xlu1 %v474_v49 }
 0x299   : > { %v476_v50 = vpop.xlane.xlu0 %475 }
 0x29d   : > { %v478_v51 = vpop.xlane.xlu1 %477 }
 0x29e   : > { %v479_v52 = vadd.f32 %v478_v51, %v476_v50 }
 0x2a0   : > { %v480_v53 = vrot.slane %v479_v52, 4 }
 0x2a2   : > { %v481_v54 = vadd.f32 %v480_v53, %v479_v52 }
 0x2a4   : > { %v482_v55 = vrot.slane %v481_v54, 2 }
 0x2a6   : > { %v483_v56 = vadd.f32 %v482_v55, %v481_v54 }
 0x2a8   : > { %v484_v57 = vrot.slane %v483_v56, 1 }
 0x2aa   : > { %v485_v58 = vadd.f32 %v484_v57, %v483_v56 }
 0x2ac   : > { %v486_v59 = vmul.f32 0.0078125, %v485_v58 }
 0x2ae   : > { %487 = vst [vmem:[%s307_s17] sm:$0x1] %v486_v59 }
 0x2af PF: > { %s18_s24 = sadd.s32 1, %s668_s24  }
 0x2b0   : > { %p15_p4 = scmp.ge.s32.totalorder %s18_s24, 4  }
 0x2b2   :  { %17 = sbr.rel (!%p15_p4) target bundleno = 1 (0x1), region = 89 }

// kernel: prediction_model_forward.5
= control target key start
LH: loop header
LB: loop body
LE: loop exit
PB: predicated region body
PF: predicated region fallthrough
CT: control target
= control target key end

     0   :  { %s2727_s25 = smov 0   ;;  %s3241_s0 = inlined_call_operand.vmem [shape: bf16[2,16,128], index: 0, kind: input, shape index: {}]   ;;  %s3242_s1 = inlined_call_operand.vmem [shape: f32[1,128], index: 1, kind: input, shape index: {}]   ;;  %s3243_s2 = inlined_call_operand.vmem [shape: f32[1,128], index: 2, kind: input, shape index: {}]   ;;  %s3244_s3 = inlined_call_operand.vmem [shape: bf16[3,2,128,64], index: 3, kind: input, shape index: {}]   ;;  %s3245_s4 = inlined_call_operand.vmem [shape: f32[3,2,1,64], index: 4, kind: input, shape index: {}]   ;;  %s3246_s5 = inlined_call_operand.vmem [shape: bf16[2,64,128], index: 5, kind: input, shape index: {}]   ;;  %s3247_s6 = inlined_call_operand.vmem [shape: f32[1,128], index: 6, kind: input, shape index: {}]   ;;  %s3248_s7 = inlined_call_operand.vmem [shape: f32[1,128], index: 7, kind: input, shape index: {}]   ;;  %s3249_s8 = inlined_call_operand.vmem [shape: f32[1,128], index: 8, kind: input, shape index: {}]   ;;  %s3250_s9 = inlined_call_operand.vmem [shape: bf16[128,256], index: 9, kind: input, shape index: {}]   ;;  %s3251_s10 = inlined_call_operand.vmem [shape: f32[1,256], index: 10, kind: input, shape index: {}]   ;;  %s3252_s11 = inlined_call_operand.vmem [shape: bf16[256,128], index: 11, kind: input, shape index: {}]   ;;  %s3253_s12 = inlined_call_operand.vmem [shape: f32[1,128], index: 12, kind: input, shape index: {}]   ;;  %s3254_s13 = inlined_call_operand.vmem [shape: bf16[2,16,128], index: 13, kind: output, shape index: {}]  }
   0x1 LB: > { %s2028_s26 = sadd.s32 4294967295, %s2652_s25   ;;  %p2032_p0 = scmp.ge.s32.totalorder %s2652_s25, 1  ;;  %s2652_s25 = sphi %s2727_s25, %s23_s25  }
   0x2   : > { %p387_p1 = scmp.lt.s32.totalorder %s2652_s25, 3 }
   0x4   : > { %p388_p2 = pnand %p2032_p0, %p387_p1 }
   0x5   : > { %p431_p3 = scmp.lt.s32.totalorder (!%p388_p2), %s2028_s26, 1 }
   0x6   : > { %391 = sbr.rel (%p388_p2) target bundleno = 3122 (0xc32), region = 72 }
   0xb   : > { %s3256_s26 = smov (!%p431_p3, %s2028_s26), 1  ;;  %v2526_v3 = vld [vmem:[%s3244_s3 + $0x38] sm:$0xff]   ;;  %v2654_v5 = vmov 0.0   ;;  %v2528_v14 = vld [vmem:[%s3244_s3 + $0x30] sm:$0xff]   ;;  %v2530_v16 = vld [vmem:[%s3244_s3 + $0x28] sm:$0xff]   ;;  %vm2655_vm0 = vmmov 0  }
   0xc   : > { %s2240_s27 = sshll.u32 %s3256_s26, 3  ;;  %v2527_v4 = vld [vmem:[%s3244_s3 + $0xb8] sm:$0xff]   ;;  %2347 = vmatprep.subr.bf16.mxu0 %v2654_v5  ;;  %2367 = vmatprep.subr.bf16.mxu1 %v2654_v5  ;;  %v2529_v15 = vld [vmem:[%s3244_s3 + $0xb0] sm:$0xff]   ;;  %v2531_v17 = vld [vmem:[%s3244_s3 + $0xa8] sm:$0xff]   ;;  %vm846_vm1 = vcmask 523264   ;;  %vm896_vm3 = vcmask 130048  }
   0xd   : > { %s435_s30 = scalar_lea.vmem %s3241_s0, %s2240_s27  ;;  %2348 = vmatpush3.bf16.msra.mxu0 %v2526_v3  ;;  %2368 = vmatpush3.bf16.msra.mxu1 %v2527_v4  ;;  %v2532_v18 = vld [vmem:[%s3244_s3 + $0x20] sm:$0xff]   ;;  %v2534_v20 = vld [vmem:[%s3244_s3 + $0x18] sm:$0xff]   ;;  %v2536_v22 = vld [vmem:[%s3244_s3 + $0x10] sm:$0xff]   ;;  %s440_s22 = scalar_lea.vmem %s3254_s13, %s2240_s27 }
   0xe   : > { %v2245_v0 = vld [vmem:[%s435_s30] sm:$0xff]   ;;  %2349 = vmatprep.subr.bf16.mxu0 %v2654_v5  ;;  %2369 = vmatprep.subr.bf16.mxu1 %v2654_v5  ;;  %v2535_v21 = vld [vmem:[%s3244_s3 + $0x98] sm:$0xff]   ;;  %v2537_v23 = vld [vmem:[%s3244_s3 + $0x90] sm:$0xff]  }
   0xf   : > { %v2743_v1 = vunpack.c.l.bf16 %v2245_v0  ;;  %v2746_v2 = vunpack.c.h.bf16 %v2245_v0  ;;  %v2533_v19 = vld [vmem:[%s3244_s3 + $0xa0] sm:$0xff]   ;;  %v2538_v24 = vld [vmem:[%s3244_s3 + $0x8] sm:$0xff]   ;;  %2363 = vmatprep.mubr.msk.bf16.mxu0 %vm2655_vm0, %v2654_v5  ;;  %2383 = vmatprep.mubr.msk.bf16.mxu1 %vm2655_vm0, %v2654_v5  ;;  %v2542_v44 = vld [vmem:[%s3244_s3 + $0x138] sm:$0xff]  }
  0x10   : > { %v2539_v25 = vld [vmem:[%s3244_s3 + $0x88] sm:$0xff]   ;;  %v2540_v26 = vld [vmem:[%s3244_s3] sm:$0xff]   ;;  %v2543_v46 = vld [vmem:[%s3244_s3 + $0x130] sm:$0xff]  }
  0x11   : > { %448 = vadd.xlane.f32.xlu0 %v2743_v1  ;;  %2350 = vmatpush3.bf16.msra.mxu0 %v2528_v14  ;;  %v2541_v27 = vld [vmem:[%s3244_s3 + $0x80] sm:$0xff]   ;;  %v2544_v47 = vld [vmem:[%s3244_s3 + $0x128] sm:$0xff]   ;;  %v2546_v49 = vld [vmem:[%s3244_s3 + $0x118] sm:$0xff]  }
  0x12   : > { %2370 = vmatpush3.bf16.msra.mxu1 %v2529_v15  ;;  %2351 = vmatprep.subr.bf16.mxu0 %v2654_v5  ;;  %v2037_v36 = vld [vmem:[%s3242_s1] ss:$0 sm:$0xff]  ;;  %v2547_v50 = vld [vmem:[%s3244_s3 + $0x110] sm:$0xff]   ;;  %v2548_v51 = vld [vmem:[%s3244_s3 + $0x108] sm:$0xff]  }
  0x13   : > { %2371 = vmatprep.subr.bf16.mxu1 %v2654_v5  ;;  %v2038_v40 = vld [vmem:[%s3243_s2] ss:$0 sm:$0xff]  ;;  %v2550_v53 = vld [vmem:[%s3244_s3 + $0x78] sm:$0xff]   ;;  %v2551_v54 = vld [vmem:[%s3244_s3 + $0x70] sm:$0xff]  }
  0x14   : > { %v2545_v48 = vld [vmem:[%s3244_s3 + $0x120] sm:$0xff]   ;;  %v2552_v55 = vld [vmem:[%s3244_s3 + $0x68] sm:$0xff]   ;;  %v2554_v57 = vld [vmem:[%s3244_s3 + $0x58] sm:$0xff]  }
  0x15   : > { %450 = vadd.xlane.f32.xlu0 %v2746_v2  ;;  %2352 = vmatpush3.bf16.msra.mxu0 %v2530_v16  ;;  %v2549_v52 = vld [vmem:[%s3244_s3 + $0x100] sm:$0xff]   ;;  %v2555_v58 = vld [vmem:[%s3244_s3 + $0x50] sm:$0xff]   ;;  %v2556_v59 = vld [vmem:[%s3244_s3 + $0x48] sm:$0xff]  }
  0x16   : > { %2372 = vmatpush3.bf16.msra.mxu1 %v2531_v17  ;;  %2353 = vmatprep.subr.bf16.mxu0 %v2654_v5  ;;  %v2553_v56 = vld [vmem:[%s3244_s3 + $0x60] sm:$0xff]   ;;  %v2558_v61 = vld [vmem:[%s3244_s3 + $0x178] sm:$0xff]   ;;  %v2559_v62 = vld [vmem:[%s3244_s3 + $0x170] sm:$0xff]  }
  0x17   : > { %2373 = vmatprep.subr.bf16.mxu1 %v2654_v5  ;;  %v2557_v60 = vld [vmem:[%s3244_s3 + $0x40] sm:$0xff]   ;;  %v2560_v63 = vld [vmem:[%s3244_s3 + $0x168] sm:$0xff]   ;;  %v2562_v3 = vld [vmem:[%s3244_s3 + $0x158] sm:$0xff]  }
  0x18   : > { %v2561_v0 = vld [vmem:[%s3244_s3 + $0x160] sm:$0xff]   ;;  %v2563_v4 = vld [vmem:[%s3244_s3 + $0x150] sm:$0xff]  }
  0x19   : > { %2354 = vmatpush3.bf16.msra.mxu0 %v2532_v18 }
  0x1a   : > { %2374 = vmatpush3.bf16.msra.mxu1 %v2533_v19  ;;  %2355 = vmatprep.subr.bf16.mxu0 %v2654_v5 }
  0x1b   : > { %2375 = vmatprep.subr.bf16.mxu1 %v2654_v5 }
  0x1d   : > { %2356 = vmatpush3.bf16.msra.mxu0 %v2534_v20 }
  0x1e   : > { %2376 = vmatpush3.bf16.msra.mxu1 %v2535_v21  ;;  %2357 = vmatprep.subr.bf16.mxu0 %v2654_v5  ;;  %v2040_v21 = vld [vmem:[%s3245_s4] ss:$0 sm:$0xff] }
  0x1f   : > { %2377 = vmatprep.subr.bf16.mxu1 %v2654_v5 }
  0x21   : > { %2358 = vmatpush3.bf16.msra.mxu0 %v2536_v22 }
  0x22   : > { %2378 = vmatpush3.bf16.msra.mxu1 %v2537_v23  ;;  %2359 = vmatprep.subr.bf16.mxu0 %v2654_v5 }
  0x23   : > { %2379 = vmatprep.subr.bf16.mxu1 %v2654_v5 }
  0x25   : > { %2360 = vmatpush3.bf16.msra.mxu0 %v2538_v24 }
  0x26   : > { %2380 = vmatpush3.bf16.msra.mxu1 %v2539_v25  ;;  %2361 = vmatprep.subr.bf16.mxu0 %v2654_v5 }
  0x27   : > { %2381 = vmatprep.subr.bf16.mxu1 %v2654_v5 }
  0x29   : > { %2362 = vmatpush3.bf16.msra.mxu0 %v2540_v26  ;;  %v2092_v26 = vld [vmem:[%s3245_s4 + $0x4] ss:$0 sm:$0xff] }
  0x2a   : > { %2382 = vmatpush3.bf16.msra.mxu1 %v2541_v27  ;;  %2387 = vmatprep.subr.bf16.mxu0 %v2654_v5 }
  0x2b   : > { %2407 = vmatprep.subr.bf16.mxu1 %v2654_v5 }
  0x9a   : > { %v449_v6 = vpop.xlane.xlu0 %448 }
  0x9b   : > { %v453_v7 = vmul.f32 0.0078125, %v449_v6  ;;  %v2564_v6 = vld [vmem:[%s3244_s3 + $0x148] sm:$0xff]  }
  0x9d   : > { %v455_v8 = vsub.f32 %v2743_v1, %v453_v7  ;;  %v2565_v7 = vld [vmem:[%s3244_s3 + $0x140] sm:$0xff]  }
  0x9e   : > { %v451_v9 = vpop.xlane.xlu0 %450 }
  0x9f   : > { %v454_v10 = vmul.f32 0.0078125, %v451_v9  ;;  %v457_v11 = vmul.f32 %v455_v8, %v455_v8 }
  0xa1   : > { %v456_v12 = vsub.f32 %v2746_v2, %v454_v10  ;;  %459 = vadd.xlane.f32.xlu1 %v457_v11  ;;  %v2066_v10 = vld [vmem:[%s3245_s4 + $0x2] ss:$0 sm:$0xff] }
  0xa3   : > { %v458_v13 = vmul.f32 %v456_v12, %v456_v12 }
  0xa5   : > { %461 = vadd.xlane.f32.xlu1 %v458_v13 }
 0x12a   : > { %v460_v28 = vpop.xlane.xlu1 %459 }
 0x12b   : > { %v463_v29 = vmul.f32 0.0078125, %v460_v28 }
 0x12d   : > { %v465_v30 = vadd.f32 1e-05, %v463_v29 }
 0x12e   : > { %v462_v31 = vpop.xlane.xlu1 %461 }
 0x12f   : > { %2622 = vrsqrt.f32 %v465_v30  ;;  %v464_v32 = vmul.f32 0.0078125, %v462_v31 }
 0x131   : > { %v466_v33 = vadd.f32 1e-05, %v464_v32 }
 0x133   : > { %2624 = vrsqrt.f32 %v466_v33 }
 0x13c   : > { %v2623_v34 = vpop.eup %2622 }
 0x13d   : > { %v469_v35 = vmul.f32 %v2623_v34, %v455_v8  ;;  %v2125_v34 = vld [vmem:[%s3245_s4 + $0x1] ss:$0 sm:$0xff] }
 0x13f   : > { %v477_v38 = vmul.f32 %v2037_v36, %v469_v35 }
 0x140   : > { %v2625_v37 = vpop.eup %2624 }
 0x141   : > { %v470_v39 = vmul.f32 %v2625_v37, %v456_v12  ;;  %v485_v42 = vadd.f32 %v2038_v40, %v477_v38 }
 0x143   : > { %v478_v41 = vmul.f32 %v2037_v36, %v470_v39 }
 0x145   : > { %v486_v43 = vadd.f32 %v2038_v40, %v478_v41 }
 0x147   : > { %v2830_v45 = vpack.c.bf16 %v486_v43, %v485_v42  ;;  %v2177_v42 = vld [vmem:[%s3245_s4 + $0x5] ss:$0 sm:$0xff] }
 0x149   : > { %2364 = vmatmul.mubr.bf16.vlgmr.msra.gmra.mxu0 %v2830_v45  ;;  %2384 = vmatmul.mubr.bf16.vlgmr.msra.gmra.mxu1 %v2830_v45 }
 0x14a   : > { %2388 = vmatpush3.bf16.msra.mxu0 %v2542_v44  ;;  %2403 = vmatprep.mubr.msk.bf16.mxu0 %vm2655_vm0, %v2654_v5 }
 0x14b   : > { %2389 = vmatprep.subr.bf16.mxu0 %v2654_v5  ;;  %2409 = vmatprep.mubr.msk.bf16.mxu1 %vm2655_vm0, %v2654_v5 }
 0x14e   : > { %2390 = vmatpush3.bf16.msra.mxu0 %v2543_v46 }
 0x14f   : > { %2391 = vmatprep.subr.bf16.mxu0 %v2654_v5 }
 0x152   : > { %2392 = vmatpush3.bf16.msra.mxu0 %v2544_v47 }
 0x153   : > { %2393 = vmatprep.subr.bf16.mxu0 %v2654_v5 }
 0x156   : > { %2394 = vmatpush3.bf16.msra.mxu0 %v2545_v48 }
 0x157   : > { %2395 = vmatprep.subr.bf16.mxu0 %v2654_v5 }
 0x15a   : > { %2396 = vmatpush3.bf16.msra.mxu0 %v2546_v49 }
 0x15b   : > { %2397 = vmatprep.subr.bf16.mxu0 %v2654_v5 }
 0x15e   : > { %2398 = vmatpush3.bf16.msra.mxu0 %v2547_v50  ;;  %v488_v50 = vlaneseq }
 0x15f   : > { %2399 = vmatprep.subr.bf16.mxu0 %v2654_v5 }
 0x162   : > { %2400 = vmatpush3.bf16.msra.mxu0 %v2548_v51  ;;  %v2970_v51 = vshrl.u32 %v488_v50, 7 }
 0x163   : > { %2401 = vmatprep.subr.bf16.mxu0 %v2654_v5 }
 0x166   : > { %2402 = vmatpush3.bf16.msra.mxu0 %v2549_v52  ;;  %v2972_v52 = vand.u32 127, %v488_v50 }
 0x167   : > { %2431 = vmatprep.subr.bf16.mxu0 %v2654_v5 }
 0x168   : > { %vm493_vm2 = vcmp.le.s32.totalorder %v2972_v52, %v2970_v51 }
 0x169   : > { %2404 = vmatmul.mubr.bf16.vlgmr.msra.gmra.mxu0 %v2830_v45 }
 0x16a   : > { %2432 = vmatpush3.bf16.msra.mxu0 %v2550_v53  ;;  %2447 = vmatprep.mubr.msk.bf16.mxu0 %vm2655_vm0, %v2654_v5  ;;  %v2977_v53 = vadd.s32 8, %v2970_v51 }
 0x16b   : > { %2433 = vmatprep.subr.bf16.mxu0 %v2654_v5 }
 0x16c   : > { %vm494_vm4 = vcmp.le.s32.totalorder %v2972_v52, %v2977_v53 }
 0x16e   : > { %2434 = vmatpush3.bf16.msra.mxu0 %v2551_v54 }
 0x16f   : > { %2435 = vmatprep.subr.bf16.mxu0 %v2654_v5 }
 0x172   : > { %2436 = vmatpush3.bf16.msra.mxu0 %v2552_v55 }
 0x173   : > { %2437 = vmatprep.subr.bf16.mxu0 %v2654_v5 }
 0x176   : > { %2438 = vmatpush3.bf16.msra.mxu0 %v2553_v56 }
 0x177   : > { %2439 = vmatprep.subr.bf16.mxu0 %v2654_v5 }
 0x17a   : > { %2440 = vmatpush3.bf16.msra.mxu0 %v2554_v57 }
 0x17b   : > { %2441 = vmatprep.subr.bf16.mxu0 %v2654_v5 }
 0x17e   : > { %2442 = vmatpush3.bf16.msra.mxu0 %v2555_v58 }
 0x17f   : > { %2443 = vmatprep.subr.bf16.mxu0 %v2654_v5 }
 0x182   : > { %2444 = vmatpush3.bf16.msra.mxu0 %v2556_v59 }
 0x183   : > { %2445 = vmatprep.subr.bf16.mxu0 %v2654_v5 }
 0x186   : > { %2446 = vmatpush3.bf16.msra.mxu0 %v2557_v60 }
 0x187   : > { %2471 = vmatprep.subr.bf16.mxu0 %v2654_v5 }
 0x189   : > { %2448 = vmatmul.mubr.bf16.vlgmr.msra.gmra.mxu0 %v2830_v45 }
 0x18a   : > { %2472 = vmatpush3.bf16.msra.mxu0 %v2558_v61  ;;  %2487 = vmatprep.mubr.msk.bf16.mxu0 %vm2655_vm0, %v2654_v5 }
 0x18b   : > { %2473 = vmatprep.subr.bf16.mxu0 %v2654_v5 }
 0x18e   : > { %2474 = vmatpush3.bf16.msra.mxu0 %v2559_v62 }
 0x18f   : > { %2475 = vmatprep.subr.bf16.mxu0 %v2654_v5 }
 0x192   : > { %2476 = vmatpush3.bf16.msra.mxu0 %v2560_v63 }
 0x193   : > { %2477 = vmatprep.subr.bf16.mxu0 %v2654_v5 }
 0x196   : > { %2478 = vmatpush3.bf16.msra.mxu0 %v2561_v0 }
 0x197   : > { %2479 = vmatprep.subr.bf16.mxu0 %v2654_v5 }
 0x19a   : > { %2480 = vmatpush3.bf16.msra.mxu0 %v2562_v3 }
 0x19b   : > { %2481 = vmatprep.subr.bf16.mxu0 %v2654_v5 }
 0x19e   : > { %2482 = vmatpush3.bf16.msra.mxu0 %v2563_v4 }
 0x19f   : > { %2483 = vmatprep.subr.bf16.mxu0 %v2654_v5 }
 0x1a2   : > { %2484 = vmatpush3.bf16.msra.mxu0 %v2564_v6 }
 0x1a3   : > { %2485 = vmatprep.subr.bf16.mxu0 %v2654_v5 }
 0x1a6   : > { %2486 = vmatpush3.bf16.msra.mxu0 %v2565_v7 }
 0x1a9   : > { %2488 = vmatmul.mubr.bf16.vlgmr.msra.gmra.mxu0 %v2830_v45 }
 0x209   : > { %v609_v8 = vpop.f32.mrf.mxu0  ;;  %v723_v9 = vpop.f32.mrf.mxu1 }
 0x20a   : > { %v724_v15 = vadd.f32 %v2066_v10, %v723_v9  ;;  %v610_v23 = vadd.f32 %v2040_v21, %v609_v8 }
 0x20b   : > { %v2365_v11 = vpop.f32.mrf.mxu0  ;;  %v2385_v12 = vpop.f32.mrf.mxu1 }
 0x20d   : > { %v612_v13 = vpop.f32.mrf.mxu0  ;;  %v726_v14 = vpop.f32.mrf.mxu1 }
 0x20e   : > { %v727_v16 = vadd.f32 %v2066_v10, %v726_v14  ;;  %v613_v22 = vadd.f32 %v2040_v21, %v612_v13  ;;  %v2569_v21 = vld [vmem:[%s3246_s5] sm:$0xff]  }
 0x20f   : > { %v2366_v17 = vpop.f32.mrf.mxu0  ;;  %v2386_v18 = vpop.f32.mrf.mxu1 }
 0x210   : > { %v845_v19 = vpack.c.bf16 %v727_v16, %v724_v15  ;;  %v844_v24 = vpack.c.bf16 %v613_v22, %v610_v23  ;;  %v2566_v17 = vld [vmem:[%s3246_s5 + $0x18] sm:$0xff]  }
 0x212   : > { %v851_v20 = vsel %vm846_vm1, %v845_v19, 0  ;;  %v2567_v19 = vld [vmem:[%s3246_s5 + $0x10] sm:$0xff]  }
 0x213   : > { %2408 = vmatpush3.bf16.xpose.msra.mxu1 %v851_v20  ;;  %v2568_v20 = vld [vmem:[%s3246_s5 + $0x8] sm:$0xff]  }
 0x214   : > { %2413 = vmatprep.subr.bf16.mxu1 %v2654_v5 }
 0x21a   : > { %2410 = vmatmul.mubr.msk.bf16.vlgmr.msra.gmra.mxu1 %vm846_vm1, %v844_v24 }
 0x21b   : > { %2415 = vmatprep.mubr.msk.bf16.mxu1 %vm2655_vm0, %v2654_v5 }
 0x229   : > { %v837_v25 = vpop.f32.mrf.mxu0 }
 0x22a   : > { %v838_v29 = vadd.f32 %v2092_v26, %v837_v25  ;;  %v2570_v25 = vld [vmem:[%s3244_s3 + $0xf8] sm:$0xff]  }
 0x22b   : > { %v2405_v27 = vpop.f32.mrf.mxu0 }
 0x22d   : > { %v840_v28 = vpop.f32.mrf.mxu0 }
 0x22e   : > { %v841_v30 = vadd.f32 %v2092_v26, %v840_v28  ;;  %v2571_v28 = vld [vmem:[%s3244_s3 + $0xf0] sm:$0xff]  }
 0x22f   : > { %v2406_v31 = vpop.f32.mrf.mxu0 }
 0x230   : > { %v920_v32 = vpack.c.bf16 %v841_v30, %v838_v29  ;;  %v2572_v29 = vld [vmem:[%s3244_s3 + $0xe8] sm:$0xff]   ;;  %v2573_v30 = vld [vmem:[%s3244_s3 + $0xe0] sm:$0xff]   ;;  %v2574_v31 = vld [vmem:[%s3244_s3 + $0xd8] sm:$0xff]  }
 0x232   : > { %2414 = vmatpush3.bf16.msra.mxu1 %v920_v32  ;;  %v2575_v32 = vld [vmem:[%s3244_s3 + $0xd0] sm:$0xff]  }
 0x233   : > { %2419 = vmatprep.subr.bf16.mxu1 %v2654_v5 }
 0x249   : > { %v1151_v33 = vpop.f32.mrf.mxu0 }
 0x24a   : > { %v2955_v37 = vadd.f32 %v2125_v34, %v1151_v33  ;;  %v2576_v33 = vld [vmem:[%s3244_s3 + $0xc8] sm:$0xff]  }
 0x24b   : > { %v2449_v35 = vpop.f32.mrf.mxu0 }
 0x24d   : > { %v1154_v36 = vpop.f32.mrf.mxu0 }
 0x24e   : > { %v2957_v38 = vadd.f32 %v2125_v34, %v1154_v36  ;;  %v2577_v34 = vld [vmem:[%s3244_s3 + $0xc0] sm:$0xff]  }
 0x24f   : > { %v2450_v39 = vpop.f32.mrf.mxu0 }
 0x250   : > { %v1386_v40 = vpack.c.bf16 %v2957_v38, %v2955_v37 }
 0x269   : > { %v1379_v41 = vpop.f32.mrf.mxu0 }
 0x26a   : > { %v2964_v46 = vadd.f32 %v2177_v42, %v1379_v41 }
 0x26b   : > { %v2489_v43 = vpop.f32.mrf.mxu0 }
 0x26c   : > { %v2151_v43 = vld [vmem:[%s3245_s4 + $0x3] ss:$0 sm:$0xff] }
 0x26d   : > { %v1382_v44 = vpop.f32.mrf.mxu0 }
 0x26e   : > { %v2966_v47 = vadd.f32 %v2177_v42, %v1382_v44 }
 0x26f   : > { %v2490_v48 = vpop.f32.mrf.mxu0 }
 0x270   : > { %v1460_v49 = vpack.c.bf16 %v2966_v47, %v2964_v46 }
 0x2da   : > { %v887_v54 = vpop.f32.mrf.mxu1 }
 0x2db   : > { %v894_v55 = vsel %vm493_vm2, %v887_v54, -1e+30 }
 0x2dc   : > { %v2411_v56 = vpop.f32.mrf.mxu1  ;;  %v897_v57 = vsel %vm896_vm3, %v894_v55, -inf }
 0x2dd   : > { %898 = vmax.xlane.f32.xlu0 %v897_v57 }
 0x2de   : > { %v890_v58 = vpop.f32.mrf.mxu1 }
 0x2df   : > { %v895_v59 = vsel %vm494_vm4, %v890_v58, -1e+30 }
 0x2e0   : > { %v2412_v60 = vpop.f32.mrf.mxu1  ;;  %v900_v61 = vsel %vm896_vm3, %v895_v59, -inf }
 0x2e1   : > { %901 = vmax.xlane.f32.xlu1 %v900_v61 }
 0x366   : > { %v899_v62 = vpop.xlane.xlu0 %898 }
 0x367   : > { %v903_v63 = vsub.f32 %v894_v55, %v899_v62 }
 0x369   : > { %v905_v0 = vmul.f32 1.442695, %v903_v63 }
 0x36a   : > { %v902_v3 = vpop.xlane.xlu1 %901 }
 0x36b   : > { %2626 = vpow2.f32 %v905_v0  ;;  %v904_v4 = vsub.f32 %v895_v59, %v902_v3 }
 0x36d   : > { %v907_v6 = vmul.f32 1.442695, %v904_v4 }
 0x36f   : > { %2628 = vpow2.f32 %v907_v6 }
 0x378   : > { %v2627_v7 = vpop.eup %2626 }
 0x379   : > { %v909_v8 = vsel %vm896_vm3, %v2627_v7, 0.0 }
 0x37a   : > { %910 = vadd.xlane.f32.xlu0 %v909_v8 }
 0x37c   : > { %v2629_v9 = vpop.eup %2628 }
 0x37d   : > { %v912_v10 = vsel %vm896_vm3, %v2629_v9, 0.0 }
 0x37e   : > { %913 = vadd.xlane.f32.xlu1 %v912_v10 }
 0x403   : > { %v911_v11 = vpop.xlane.xlu0 %910 }
 0x404   : > { %2630 = vrcp.f32 %v911_v11 }
 0x407   : > { %v914_v12 = vpop.xlane.xlu1 %913 }
 0x408   : > { %2632 = vrcp.f32 %v914_v12  ;;  %v2578_v12 = vld [vmem:[%s3246_s5 + $0x38] sm:$0xff]  }
 0x411   : > { %v2631_v13 = vpop.eup %2630 }
 0x412   : > { %v916_v15 = vmul.f32 %v2631_v13, %v2627_v7 }
 0x415   : > { %v2633_v14 = vpop.eup %2632 }
 0x416   : > { %v918_v16 = vmul.f32 %v2633_v14, %v2629_v9  ;;  %v2579_v14 = vld [vmem:[%s3246_s5 + $0x30] sm:$0xff]  }
 0x418   : > { %v919_v18 = vpack.c.bf16 %v918_v16, %v916_v15  ;;  %v2580_v15 = vld [vmem:[%s3246_s5 + $0x28] sm:$0xff]   ;;  %v2581_v16 = vld [vmem:[%s3246_s5 + $0x20] sm:$0xff]  }
 0x41a   : > { %2416 = vmatmul.mubr.msk.bf16.vlgmr.msra.gmra.mxu1 %vm896_vm3, %v919_v18 }
 0x41b   : > { %2420 = vmatpush3.bf16.msra.mxu1 %v2566_v17  ;;  %2427 = vmatprep.mubr.msk.bf16.mxu1 %vm2655_vm0, %v2654_v5 }
 0x41c   : > { %2421 = vmatprep.subr.bf16.mxu1 %v2654_v5 }
 0x41f   : > { %2422 = vmatpush3.bf16.msra.mxu1 %v2567_v19 }
 0x420   : > { %2423 = vmatprep.subr.bf16.mxu1 %v2654_v5 }
 0x423   : > { %2424 = vmatpush3.bf16.msra.mxu1 %v2568_v20 }
 0x424   : > { %2425 = vmatprep.subr.bf16.mxu1 %v2654_v5 }
 0x427   : > { %2426 = vmatpush3.bf16.msra.mxu1 %v2569_v21 }
 0x428   : > { %2451 = vmatprep.subr.bf16.mxu1 %v2654_v5 }
 0x4da   : > { %v958_v22 = vpop.f32.mrf.mxu1 }
 0x4dc   : > { %v2417_v23 = vpop.f32.mrf.mxu1 }
 0x4de   : > { %v961_v24 = vpop.f32.mrf.mxu1 }
 0x4df   : > { %v965_v26 = vpack.c.bf16 %v961_v24, %v958_v22  ;;  %v2039_v22 = vld [vmem:[%s3247_s6] ss:$0 sm:$0xff] }
 0x4e0   : > { %v2418_v27 = vpop.f32.mrf.mxu1  ;;  %v502_v23 = vadd.f32 %v2743_v1, %v2039_v22  ;;  %v503_v24 = vadd.f32 %v2746_v2, %v2039_v22  ;;  %v2582_v1 = vld [vmem:[%s3250_s9 + $0x70] ss:$8 sps:$4 sm:$0xff]   ;;  %v2584_v2 = vld [vmem:[%s3250_s9 + $0x74] ss:$8 sps:$4 sm:$0xff]  }
 0x4e1   : > { %2428 = vmatmul.mubr.msk.bf16.vlgmr.msra.gmra.mxu1 %vm846_vm1, %v965_v26  ;;  %1734 = vmatprep.subr.bf16.mxu0 %v2584_v2  ;;  %v2616_v22 = vld [vmem:[%s3252_s11 + $0x50] sm:$0xff]  }
 0x4e2   : > { %2452 = vmatpush3.bf16.msra.mxu1 %v2570_v25  ;;  %2467 = vmatprep.mubr.msk.bf16.mxu1 %vm2655_vm0, %v2654_v5 }
 0x4e3   : > { %2453 = vmatprep.subr.bf16.mxu1 %v2654_v5  ;;  %1735 = vmatpush1.bf16.msra.mxu0 %v2582_v1 }
 0x4e6   : > { %2454 = vmatpush3.bf16.msra.mxu1 %v2571_v28 }
 0x4e7   : > { %2455 = vmatprep.subr.bf16.mxu1 %v2654_v5 }
 0x4ea   : > { %2456 = vmatpush3.bf16.msra.mxu1 %v2572_v29 }
 0x4eb   : > { %2457 = vmatprep.subr.bf16.mxu1 %v2654_v5 }
 0x4ee   : > { %2458 = vmatpush3.bf16.msra.mxu1 %v2573_v30 }
 0x4ef   : > { %2459 = vmatprep.subr.bf16.mxu1 %v2654_v5 }
 0x4f2   : > { %2460 = vmatpush3.bf16.msra.mxu1 %v2574_v31 }
 0x4f3   : > { %2461 = vmatprep.subr.bf16.mxu1 %v2654_v5 }
 0x4f6   : > { %2462 = vmatpush3.bf16.msra.mxu1 %v2575_v32 }
 0x4f7   : > { %2463 = vmatprep.subr.bf16.mxu1 %v2654_v5 }
 0x4fa   : > { %2464 = vmatpush3.bf16.msra.mxu1 %v2576_v33 }
 0x4fb   : > { %2465 = vmatprep.subr.bf16.mxu1 %v2654_v5 }
 0x4fe   : > { %2466 = vmatpush3.bf16.msra.mxu1 %v2577_v34 }
 0x4ff   : > { %2491 = vmatprep.subr.bf16.mxu1 %v2654_v5 }
 0x501   : > { %2468 = vmatmul.mubr.bf16.vlgmr.msra.gmra.mxu1 %v2830_v45 }
 0x502   : > { %2493 = vmatprep.mubr.msk.bf16.mxu1 %vm2655_vm0, %v2654_v5 }
 0x5a1   : > { %v3048_v35 = vpop.f32.mrf.mxu1 }
 0x5a3   : > { %v2429_v36 = vpop.f32.mrf.mxu1 }
 0x5a5   : > { %v3050_v39 = vpop.f32.mrf.mxu1 }
 0x5a6   : > { %v1043_v28 = vadd.f32 %v3050_v39, %v503_v24  ;;  %v2619_v24 = vld [vmem:[%s3252_s11 + $0x8] sm:$0xff]  }
 0x5a7   : > { %v2430_v41 = vpop.f32.mrf.mxu1 }
 0x5c1   : > { %v1265_v42 = vpop.f32.mrf.mxu1 }
 0x5c2   : > { %v1266_v50 = vadd.f32 %v2151_v43, %v1265_v42 }
 0x5c3   : > { %v2469_v44 = vpop.f32.mrf.mxu1 }
 0x5c4   : > { %v2585_v44 = vld [vmem:[%s3250_s9 + $0x60] ss:$8 sps:$4 sm:$0xff]  }
 0x5c5   : > { %v1268_v48 = vpop.f32.mrf.mxu1 }
 0x5c6   : > { %v1269_v54 = vadd.f32 %v2151_v43, %v1268_v48  ;;  %v2587_v43 = vld [vmem:[%s3250_s9 + $0x64] ss:$8 sps:$4 sm:$0xff]   ;;  %v2590_v48 = vld [vmem:[%s3250_s9 + $0x54] ss:$8 sps:$4 sm:$0xff]  }
 0x5c7   : > { %v2470_v55 = vpop.f32.mrf.mxu1  ;;  %1736 = vmatprep.subr.bf16.mxu0 %v2587_v43 }
 0x5c8   : > { %v1387_v45 = vpack.c.bf16 %v1269_v54, %v1266_v50  ;;  %1737 = vmatpush1.bf16.msra.mxu0 %v2585_v44  ;;  %v2588_v50 = vld [vmem:[%s3250_s9 + $0x50] ss:$8 sps:$4 sm:$0xff]   ;;  %v2591_v54 = vld [vmem:[%s3250_s9 + $0x40] ss:$8 sps:$4 sm:$0xff]   ;;  %v2593_v55 = vld [vmem:[%s3250_s9 + $0x44] ss:$8 sps:$4 sm:$0xff]  }
 0x5c9   : > { %1738 = vmatprep.subr.bf16.mxu0 %v2590_v48 }
 0x5ca   : > { %v1392_v56 = vsel %vm846_vm1, %v1387_v45, 0  ;;  %v2596_v45 = vld [vmem:[%s3250_s9 + $0x34] ss:$8 sps:$4 sm:$0xff]  }
 0x5cb   : > { %2492 = vmatpush3.bf16.xpose.msra.mxu1 %v1392_v56  ;;  %v2594_v56 = vld [vmem:[%s3250_s9 + $0x30] ss:$8 sps:$4 sm:$0xff]  }
 0x5cc   : > { %2497 = vmatprep.subr.bf16.mxu1 %v2654_v5  ;;  %1739 = vmatpush1.bf16.msra.mxu0 %v2588_v50 }
 0x5cd   : > { %1740 = vmatprep.subr.bf16.mxu0 %v2593_v55 }
 0x5d0   : > { %1741 = vmatpush1.bf16.msra.mxu0 %v2591_v54 }
 0x5d1   : > { %1742 = vmatprep.subr.bf16.mxu0 %v2596_v45 }
 0x5d2   : > { %2494 = vmatmul.mubr.msk.bf16.vlgmr.msra.gmra.mxu1 %vm846_vm1, %v1386_v40 }
 0x5d3   : > { %2498 = vmatpush3.bf16.msra.mxu1 %v1460_v49  ;;  %2499 = vmatprep.mubr.msk.bf16.mxu1 %vm2655_vm0, %v2654_v5 }
 0x5d4   : > { %2503 = vmatprep.subr.bf16.mxu1 %v2654_v5  ;;  %1743 = vmatpush1.bf16.msra.mxu0 %v2594_v56 }
 0x692   : > { %v1428_v57 = vpop.f32.mrf.mxu1 }
 0x693   : > { %v1435_v58 = vsel %vm493_vm2, %v1428_v57, -1e+30  ;;  %v2599_v57 = vld [vmem:[%s3250_s9 + $0x24] ss:$8 sps:$4 sm:$0xff]  }
 0x694   : > { %v2495_v59 = vpop.f32.mrf.mxu1  ;;  %v1437_v60 = vsel %vm896_vm3, %v1435_v58, -inf  ;;  %1744 = vmatprep.subr.bf16.mxu0 %v2599_v57 }
 0x695   : > { %1438 = vmax.xlane.f32.xlu0 %v1437_v60  ;;  %v2597_v59 = vld [vmem:[%s3250_s9 + $0x20] ss:$8 sps:$4 sm:$0xff]   ;;  %v2602_v60 = vld [vmem:[%s3250_s9 + $0x14] ss:$8 sps:$4 sm:$0xff]  }
 0x696   : > { %v1431_v37 = vpop.f32.mrf.mxu1  ;;  %1745 = vmatpush1.bf16.msra.mxu0 %v2597_v59 }
 0x697   : > { %v1436_v38 = vsel %vm494_vm4, %v1431_v37, -1e+30  ;;  %v2600_v37 = vld [vmem:[%s3250_s9 + $0x10] ss:$8 sps:$4 sm:$0xff]   ;;  %1746 = vmatprep.subr.bf16.mxu0 %v2602_v60 }
 0x698   : > { %v2496_v40 = vpop.f32.mrf.mxu1  ;;  %v1440_v46 = vsel %vm896_vm3, %v1436_v38, -inf }
 0x699   : > { %1441 = vmax.xlane.f32.xlu1 %v1440_v46  ;;  %v2603_v40 = vld [vmem:[%s3250_s9] ss:$8 sps:$4 sm:$0xff]   ;;  %v2606_v46 = vld [vmem:[%s3252_s11 + $0x78] sm:$0xff]  }
 0x69a   : > { %1747 = vmatpush1.bf16.msra.mxu0 %v2600_v37  ;;  %v2235_v37 = vld [vmem:[%s3253_s12] ss:$0 sm:$0xff] }
 0x71e   : > { %v1439_v47 = vpop.xlane.xlu0 %1438 }
 0x71f   : > { %v1443_v49 = vsub.f32 %v1435_v58, %v1439_v47  ;;  %v2656_v58 = vmov 0   ;;  %v2607_v47 = vld [vmem:[%s3252_s11 + $0x38] sm:$0xff]  }
 0x720   : > { %1766 = vmatprep.mubr.bf16.mxu0 %v2656_v58 }
 0x721   : > { %v1445_v61 = vmul.f32 1.442695, %v1443_v49  ;;  %v2608_v49 = vld [vmem:[%s3252_s11 + $0x70] sm:$0xff]  }
 0x722   : > { %v1442_v62 = vpop.xlane.xlu1 %1441 }
 0x723   : > { %2634 = vpow2.f32 %v1445_v61  ;;  %v1444_v63 = vsub.f32 %v1436_v38, %v1442_v62  ;;  %v2605_v38 = vld [vmem:[%s3250_s9 + $0x4] ss:$8 sps:$4 sm:$0xff]   ;;  %v2609_v61 = vld [vmem:[%s3252_s11 + $0x30] sm:$0xff]  }
 0x724   : > { %1748 = vmatprep.subr.bf16.mxu0 %v2605_v38  ;;  %v2610_v62 = vld [vmem:[%s3252_s11 + $0x68] sm:$0xff]  }
 0x725   : > { %v1447_v0 = vmul.f32 1.442695, %v1444_v63  ;;  %1749 = vmatpush1.bf16.msra.mxu0 %v2603_v40  ;;  %v2611_v63 = vld [vmem:[%s3252_s11 + $0x28] sm:$0xff]  }
 0x727   : > { %2636 = vpow2.f32 %v1447_v0  ;;  %v2612_v0 = vld [vmem:[%s3252_s11 + $0x60] sm:$0xff]  }
 0x730   : > { %v2635_v3 = vpop.eup %2634 }
 0x731   : > { %v1449_v4 = vsel %vm896_vm3, %v2635_v3, 0.0 }
 0x732   : > { %1450 = vadd.xlane.f32.xlu0 %v1449_v4  ;;  %v2614_v4 = vld [vmem:[%s3252_s11 + $0x58] sm:$0xff]  }
 0x734   : > { %v2637_v6 = vpop.eup %2636 }
 0x735   : > { %v1452_v52 = vsel %vm896_vm3, %v2637_v6, 0.0 }
 0x736   : > { %1453 = vadd.xlane.f32.xlu1 %v1452_v52 }
 0x7bb   : > { %v1451_v53 = vpop.xlane.xlu0 %1450 }
 0x7bc   : > { %2638 = vrcp.f32 %v1451_v53 }
 0x7bf   : > { %v1454_v7 = vpop.xlane.xlu1 %1453 }
 0x7c0   : > { %2640 = vrcp.f32 %v1454_v7 }
 0x7c9   : > { %v2639_v8 = vpop.eup %2638 }
 0x7ca   : > { %v1456_v10 = vmul.f32 %v2639_v8, %v2635_v3  ;;  %v2613_v3 = vld [vmem:[%s3252_s11 + $0x20] sm:$0xff]  }
 0x7cd   : > { %v2641_v9 = vpop.eup %2640 }
 0x7ce   : > { %v1458_v11 = vmul.f32 %v2641_v9, %v2637_v6  ;;  %v2615_v6 = vld [vmem:[%s3252_s11 + $0x18] sm:$0xff]  }
 0x7d0   : > { %v1459_v13 = vpack.c.bf16 %v1458_v11, %v1456_v10 }
 0x7d2   : > { %2500 = vmatmul.mubr.msk.bf16.vlgmr.msra.gmra.mxu1 %vm896_vm3, %v1459_v13  ;;  %v2201_v13 = vld [vmem:[%s3248_s7] ss:$0 sm:$0xff] }
 0x7d3   : > { %2504 = vmatpush3.bf16.msra.mxu1 %v2578_v12  ;;  %2511 = vmatprep.mubr.msk.bf16.mxu1 %vm2655_vm0, %v2654_v5 }
 0x7d4   : > { %2505 = vmatprep.subr.bf16.mxu1 %v2654_v5 }
 0x7d7   : > { %2506 = vmatpush3.bf16.msra.mxu1 %v2579_v14 }
 0x7d8   : > { %2507 = vmatprep.subr.bf16.mxu1 %v2654_v5 }
 0x7db   : > { %2508 = vmatpush3.bf16.msra.mxu1 %v2580_v15 }
 0x7dc   : > { %2509 = vmatprep.subr.bf16.mxu1 %v2654_v5  ;;  %v1042_v5 = vadd.f32 %v3048_v35, %v502_v23  ;;  %v2617_v23 = vld [vmem:[%s3252_s11 + $0x10] sm:$0xff]  }
 0x7df   : > { %2510 = vmatpush3.bf16.msra.mxu1 %v2581_v16 }
 0x7e0   : > { %2325 = vmatprep.subr.bf16.mxu1 %v2606_v46 }
 0x892   : > { %v1498_v17 = vpop.f32.mrf.mxu1 }
 0x894   : > { %v2501_v18 = vpop.f32.mrf.mxu1 }
 0x896   : > { %v1501_v19 = vpop.f32.mrf.mxu1 }
 0x897   : > { %v1505_v20 = vpack.c.bf16 %v1501_v19, %v1498_v17  ;;  %v2202_v17 = vld [vmem:[%s3249_s8] ss:$0 sm:$0xff] }
 0x898   : > { %v2502_v21 = vpop.f32.mrf.mxu1 }
 0x899   : > { %2512 = vmatmul.mubr.msk.bf16.vlgmr.msra.gmra.mxu1 %vm846_vm1, %v1505_v20 }
 0x89a   : > { %2326 = vmatpush3.bf16.msra.mxu1 %v2607_v47 }
 0x89b   : > { %2327 = vmatprep.subr.bf16.mxu1 %v2608_v49 }
 0x89e   : > { %2328 = vmatpush3.bf16.msra.mxu1 %v2609_v61 }
 0x89f   : > { %2329 = vmatprep.subr.bf16.mxu1 %v2610_v62 }
 0x8a2   : > { %2330 = vmatpush3.bf16.msra.mxu1 %v2611_v63 }
 0x8a3   : > { %2331 = vmatprep.subr.bf16.mxu1 %v2612_v0 }
 0x8a6   : > { %2332 = vmatpush3.bf16.msra.mxu1 %v2613_v3 }
 0x8a7   : > { %2333 = vmatprep.subr.bf16.mxu1 %v2614_v4 }
 0x8aa   : > { %2334 = vmatpush3.bf16.msra.mxu1 %v2615_v6 }
 0x8ab   : > { %2335 = vmatprep.subr.bf16.mxu1 %v2616_v22 }
 0x8ae   : > { %2336 = vmatpush3.bf16.msra.mxu1 %v2617_v23 }
 0x959   : > { %v1576_v25 = vpop.f32.mrf.mxu1 }
 0x95a   : > { %v3102_v26 = vadd.f32 %v1576_v25, %v1042_v5  ;;  %v2618_v5 = vld [vmem:[%s3252_s11 + $0x48] sm:$0xff]   ;;  %v2620_v25 = vld [vmem:[%s3252_s11 + $0x40] sm:$0xff]  }
 0x95b   : > { %v2513_v27 = vpop.f32.mrf.mxu1  ;;  %2337 = vmatprep.subr.bf16.mxu1 %v2618_v5 }
 0x95c   : > { %1587 = vadd.xlane.f32.xlu0 %v3102_v26  ;;  %2338 = vmatpush3.bf16.msra.mxu1 %v2619_v24  ;;  %v2621_v27 = vld [vmem:[%s3252_s11] sm:$0xff]  }
 0x95d   : > { %v1579_v29 = vpop.f32.mrf.mxu1  ;;  %2339 = vmatprep.subr.bf16.mxu1 %v2620_v25 }
 0x95e   : > { %v3106_v30 = vadd.f32 %v1579_v29, %v1043_v28  ;;  %v1650_v28 = vsub.s32 1, %v2970_v51  ;;  %v1646_v29 = vsub.s32 0, %v2970_v51 }
 0x95f   : > { %v2514_v31 = vpop.f32.mrf.mxu1 }
 0x960   : > { %1589 = vadd.xlane.f32.xlu1 %v3106_v30  ;;  %2340 = vmatpush3.bf16.msra.mxu1 %v2621_v27  ;;  %v1642_v31 = vld [vmem:[%s3251_s10] sm:$0x3] }
 0x961   : > { %v1651_v2 = vrot.slane %v1642_v31, %v1650_v28 }
 0x9e5   : > { %v1588_v32 = vpop.xlane.xlu0 %1587 }
 0x9e6   : > { %v1591_v33 = vmul.f32 0.0078125, %v1588_v32  ;;  %v1647_v32 = vrot.slane %v1642_v31, %v1646_v29 }
 0x9e8   : > { %v3116_v34 = vsub.f32 %v3102_v26, %v1591_v33 }
 0x9e9   : > { %v1590_v35 = vpop.xlane.xlu1 %1589 }
 0x9ea   : > { %v1592_v36 = vmul.f32 0.0078125, %v1590_v35  ;;  %v1595_v39 = vmul.f32 %v3116_v34, %v3116_v34 }
 0x9ec   : > { %v3121_v41 = vsub.f32 %v3106_v30, %v1592_v36  ;;  %1597 = vadd.xlane.f32.xlu0 %v1595_v39 }
 0x9ee   : > { %v1596_v42 = vmul.f32 %v3121_v41, %v3121_v41 }
 0x9f0   : > { %1599 = vadd.xlane.f32.xlu1 %v1596_v42 }
 0xa75   : > { %v1598_v52 = vpop.xlane.xlu0 %1597 }
 0xa76   : > { %v1601_v53 = vmul.f32 0.0078125, %v1598_v52 }
 0xa78   : > { %v1603_v7 = vadd.f32 1e-05, %v1601_v53 }
 0xa79   : > { %v1600_v8 = vpop.xlane.xlu1 %1599 }
 0xa7a   : > { %2642 = vrsqrt.f32 %v1603_v7  ;;  %v1602_v9 = vmul.f32 0.0078125, %v1600_v8 }
 0xa7c   : > { %v1604_v10 = vadd.f32 1e-05, %v1602_v9 }
 0xa7e   : > { %2644 = vrsqrt.f32 %v1604_v10 }
 0xa87   : > { %v2643_v11 = vpop.eup %2642 }
 0xa88   : > { %v1607_v12 = vmul.f32 %v2643_v11, %v3116_v34 }
 0xa8a   : > { %v1615_v16 = vmul.f32 %v2201_v13, %v1607_v12 }
 0xa8b   : > { %v2645_v14 = vpop.eup %2644 }
 0xa8c   : > { %v1608_v15 = vmul.f32 %v2645_v14, %v3121_v41  ;;  %v1623_v19 = vadd.f32 %v2202_v17, %v1615_v16 }
 0xa8e   : > { %v1616_v18 = vmul.f32 %v2201_v13, %v1608_v15 }
 0xa90   : > { %v1624_v20 = vadd.f32 %v2202_v17, %v1616_v18 }
 0xa92   : > { %v1625_v21 = vpack.c.bf16 %v1624_v20, %v1623_v19 }
 0xa94   : > { %1767 = vmatmul.mubr.bf16.vlgmr.msra.gmra.mxu0 %v1625_v21 }
 0xb54   : > { %v1768_v1 = vpop.f32.mrf.mxu0 }
 0xb55   : > { %v1769_v39 = vadd.f32 %v1768_v1, %v1647_v32 }
 0xb56   : > { %v1770_v33 = vpop.f32.mrf.mxu0 }
 0xb57   : > { %v1771_v35 = vadd.f32 %v1770_v33, %v1651_v2  ;;  %v1777_v50 = vmax.f32 %v1769_v39, 0.0 }
 0xb58   : > { %v1772_v34 = vpop.f32.mrf.mxu0 }
 0xb59   : > { %v1773_v36 = vadd.f32 %v1772_v34, %v1647_v32  ;;  %v1778_v44 = vmax.f32 %v1771_v35, 0.0 }
 0xb5a   : > { %v1774_v41 = vpop.f32.mrf.mxu0 }
 0xb5b   : > { %v1775_v42 = vadd.f32 %v1774_v41, %v1651_v2  ;;  %v1779_v43 = vmax.f32 %v1773_v36, 0.0 }
 0xb5d   : > { %v1780_v48 = vmax.f32 %v1775_v42, 0.0  ;;  %v1781_v54 = vpack.c.bf16 %v1779_v43, %v1777_v50 }
 0xb5f   : > { %v1782_v51 = vpack.c.bf16 %v1780_v48, %v1778_v44 }
 0xb61   : > { %1943 = vmatprep.mubr.bf16.mxu1 %v1782_v51 }
 0xb62   : > { %1944 = vmatmul.mubr.bf16.vlgmr.msra.gmra.mxu1 %v1781_v54 }
 0xc22   : > { %v2341_v55 = vpop.f32.mrf.mxu1 }
 0xc24   : > { %v2342_v45 = vpop.f32.mrf.mxu1 }
 0xc25   : > { %v2343_v56 = vadd.f32 %v2342_v45, %v2341_v55 }
 0xc26   : > { %v2344_v57 = vpop.f32.mrf.mxu1 }
 0xc27   : > { %v1952_v59 = vadd.f32 %v2343_v56, %v3102_v26 }
 0xc28   : > { %v2345_v58 = vpop.f32.mrf.mxu1 }
 0xc29   : > { %v2346_v60 = vadd.f32 %v2345_v58, %v2344_v57  ;;  %v1961_v40 = vadd.f32 %v2235_v37, %v1952_v59 }
 0xc2b   : > { %v1953_v38 = vadd.f32 %v2346_v60, %v3106_v30 }
 0xc2d   : > { %v1962_v46 = vadd.f32 %v2235_v37, %v1953_v38 }
 0xc2f   : > { %v2251_v47 = vpack.c.bf16 %v1962_v46, %v1961_v40 }
 0xc31   : > { %2252 = vst [vmem:[%s440_s22] sm:$0xff] %v2251_v47  }
 0xc32 PF: > { %s23_s25 = sadd.s32 1, %s2652_s25  }
 0xc33   : > { %p20_p4 = scmp.ge.s32.totalorder %s23_s25, 4  }
 0xc35   :  { %22 = sbr.rel (!%p20_p4) target bundleno = 1 (0x1), region = 113 }

</bundles_post_ra>
